<compile_context>
chip_gen: v5e
topology: v5e:2x2
jax: 0.10.0
libtpu: 0.0.40
codegen_flags: <defaults>
</compile_context>

<pallas_src>
import functools

import jax
import jax.numpy as jnp
import numpy as np
from jax.experimental import pallas as pl
from jax.experimental.pallas import tpu as pltpu


# ----------------------------------------------------------------------------
# Weight re-packing helpers (tiny XLA ops, run once per call in the wrapper)
# ----------------------------------------------------------------------------
def _conv_band_mats(w, w_in, w_out, col_off=0):
    """Band matrices for a VALID 3x3 conv on a lane-dense (rows, w_in*Ci) slab.

    Returns B of shape (3, w_in*Ci, w_out*Co) such that
        z[r, wo*Co + co] = sum_kh  x[r + kh, :] @ B[kh]
    The valid input-column window starts at `col_off` (used to fold the
    skip-connection center crop directly into the weights).
    """
    Ci, Co = w.shape[2], w.shape[3]
    t = jnp.arange(w_in)[None, :] - jnp.arange(w_out)[:, None] - col_off  # (w_out, w_in)
    mask = (t >= 0) & (t <= 2)
    tc = jnp.clip(t, 0, 2)
    band = w[:, tc, :, :] * mask[None, :, :, None, None].astype(w.dtype)  # (3, w_out, w_in, Ci, Co)
    band = band.transpose(0, 2, 3, 1, 4)                                  # (3, w_in, Ci, w_out, Co)
    return band.reshape(3, w_in * Ci, w_out * Co)


def _upconv_band_mats(wt, w_in):
    """Interleaving matrices for ConvTranspose2d(kernel=2, stride=2).

    Returns M of shape (2, w_in*Cin, 2*w_in*Ch) such that row 2*h+p of the
    upsampled map (lanes flattened as wout*Ch + c) equals X1[h, :] @ M[p].
    """
    Cin, Ch = wt.shape[2], wt.shape[3]
    w_out = 2 * w_in
    t = jnp.arange(w_out)[None, :] - 2 * jnp.arange(w_in)[:, None]        # (w_in, w_out)
    mask = (t >= 0) & (t <= 1)
    tc = jnp.clip(t, 0, 1)
    band = wt[:, tc, :, :] * mask[None, :, :, None, None].astype(wt.dtype)  # (2, w_in, w_out, Cin, Ch)
    band = band.transpose(0, 1, 3, 2, 4)                                    # (2, w_in, Cin, w_out, Ch)
    return band.reshape(2, w_in * Cin, w_out * Ch)


def _bn_affine(s_rows, q_rows, w_out, c, count, eps=1e-5):
    """Combine per-sample row sums -> per-channel BN affine, tiled lane-dense."""
    tot = jnp.sum(s_rows.reshape(-1, w_out, c), axis=(0, 1))
    tot2 = jnp.sum(q_rows.reshape(-1, w_out, c), axis=(0, 1))
    mean = tot / count
    # E[x^2] - mean^2 in f32, clamped at 0 (stats are accumulated in f32).
    var = jnp.maximum(tot2 / count - mean * mean, 0.0)
    scale = jax.lax.rsqrt(var + eps)
    shift = -mean * scale
    return jnp.tile(scale, w_out)[None, :], jnp.tile(shift, w_out)[None, :]


# ----------------------------------------------------------------------------
# Kernel 1: transposed conv (2 matmuls) + crop/concat-free conv1 (6 matmuls)
#           + BN1 partial sums.  All operands stay lane-dense 2-D.
# ----------------------------------------------------------------------------
def _up_conv1_kernel(x1p_ref, x2_ref, m_ref, b1a_ref, b1b_ref, b1r_ref,
                     z1_ref, s1_ref, q1_ref, *, row_off):
    ho = z1_ref.shape[1]
    xp = x1p_ref[0]                                               # (H+1, W1*Cin)
    # Upsampled x1: xp[1:] is the even-row expansion, xp[:-1] the odd-row one,
    # so rows come out already interleaved.  The ConvTranspose bias is folded
    # into b1r in the wrapper, so no elementwise add here.  Stays in VMEM.
    x1u = (jnp.dot(xp[1:], m_ref[0], preferred_element_type=jnp.float32)
           + jnp.dot(xp[:-1], m_ref[1], preferred_element_type=jnp.float32))
    acc = jnp.zeros(z1_ref.shape[1:], jnp.float32)                # (Ho1, Wo1*Cm)
    for kh in range(3):
        # x2 part: crop handled by row_off + band-matrix column offset.
        acc = acc + jnp.dot(x2_ref[0, row_off + kh:row_off + kh + ho, :],
                            b1a_ref[kh], preferred_element_type=jnp.float32)
        # upconv part (split-weight partial conv; replaces the channel concat).
        acc = acc + jnp.dot(x1u[kh:kh + ho, :], b1b_ref[kh],
                            preferred_element_type=jnp.float32)
    acc = acc + b1r_ref[...]
    z1_ref[0] = acc
    s1_ref[0] = jnp.sum(acc, axis=0, keepdims=True)
    q1_ref[0] = jnp.sum(acc * acc, axis=0, keepdims=True)


# ----------------------------------------------------------------------------
# Kernel 2: BN1 (affine) + ReLU + conv2 (3 matmuls) + BN2 partial sums
# ----------------------------------------------------------------------------
def _bn_relu_conv2_kernel(z1_ref, sc_ref, sh_ref, b2_ref, b2r_ref,
                          z2_ref, s2_ref, q2_ref):
    ho = z2_ref.shape[1]
    a = jnp.maximum(z1_ref[0] * sc_ref[...] + sh_ref[...], 0.0)   # (Ho1, Wo1*Cm)
    acc = jnp.zeros(z2_ref.shape[1:], jnp.float32)                # (Ho2, Wo2*Co)
    for kh in range(3):
        acc = acc + jnp.dot(a[kh:kh + ho, :], b2_ref[kh],
                            preferred_element_type=jnp.float32)
    acc = acc + b2r_ref[...]
    z2_ref[0] = acc
    s2_ref[0] = jnp.sum(acc, axis=0, keepdims=True)
    q2_ref[0] = jnp.sum(acc * acc, axis=0, keepdims=True)


# ----------------------------------------------------------------------------
# Kernel 3: final BN (affine) + ReLU, written in place over z2
# ----------------------------------------------------------------------------
def _bn_relu_kernel(z2_ref, sc_ref, sh_ref, o_ref):
    o_ref[0] = jnp.maximum(z2_ref[0] * sc_ref[...] + sh_ref[...], 0.0)


# ----------------------------------------------------------------------------
# Full Up.forward
# ----------------------------------------------------------------------------
def up_forward(x1, x2, params):
    N, H1, W1, Cin = x1.shape
    Ch = Cin // 2
    H, W = 2 * H1, 2 * W1
    _, H2, W2, Ch2 = x2.shape
    assert Ch2 == Ch
    dY, dX = H2 - H, W2 - W
    # torch.cat in the reference module only concatenates cleanly for even
    # diffY/diffX; enforce the same precondition here.
    assert dY >= 0 and dX >= 0 and dY % 2 == 0 and dX % 2 == 0
    dy0, dx0 = dY // 2, dX // 2

    wt, bt = params["wt"], params["bt"]
    w1, b1 = params["w1"], params["b1"]
    w2, b2 = params["w2"], params["b2"]
    Cm, Co = w1.shape[-1], w2.shape[-1]
    Ho1, Wo1 = H - 2, W - 2
    Ho2, Wo2 = Ho1 - 2, Wo1 - 2
    f32 = jnp.float32

    # ---- weight re-packing (tiny, once per call) ---------------------------
    M = _upconv_band_mats(wt, W1)                              # (2, W1*Cin, W*Ch)
    B1a = _conv_band_mats(w1[:, :, :Ch, :], W2, Wo1, dx0)      # (3, W2*Ch, Wo1*Cm)
    B1b = _conv_band_mats(w1[:, :, Ch:, :], W, Wo1, 0)         # (3, W*Ch,  Wo1*Cm)
    # Fold the ConvTranspose bias through conv1's band matrices: every upconv
    # row carries +bt at every column, so its contribution to every conv1
    # output row is the constant row  btr @ sum_kh B1b[kh].
    btr = jnp.tile(bt, W)[None, :].astype(f32)                 # (1, W*Ch)
    b1r = jnp.tile(b1, Wo1)[None, :].astype(f32) + btr @ jnp.sum(B1b, axis=0)
    B2 = _conv_band_mats(w2, Wo1, Wo2, 0)                      # (3, Wo1*Cm, Wo2*Co)
    b2r = jnp.tile(b2, Wo2)[None, :].astype(f32)               # (1, Wo2*Co)

    # ---- lane-dense per-sample slabs ---------------------------------------
    # Single zero-row-expanded x1 slab: X1p[:, 2h+1, :] = X1[:, h, :], other
    # rows zero.  Kernel views xp[1:] (even upconv rows) and xp[:-1] (odd).
    X1 = x1.reshape(N, H1, W1 * Cin).astype(f32)
    X1p = jnp.zeros((N, H + 1, W1 * Cin), f32).at[:, 1::2, :].set(X1)
    X2r = x2.reshape(N, H2, W2 * Ch).astype(f32)

    par = pltpu.CompilerParams(dimension_semantics=("parallel",))
    # TODO(synk): for realistic UNet sizes add a row-block grid axis (2-row
    # halo) and set vmem_limit_bytes so double-buffered blocks fit v7x's VMEM.

    # ---- pass 1: upconv + conv1 + BN1 partial sums -------------------------
    z1, s1, q1 = pl.pallas_call(
        functools.partial(_up_conv1_kernel, row_off=dy0),
        out_shape=(
            jax.ShapeDtypeStruct((N, Ho1, Wo1 * Cm), f32),
            jax.ShapeDtypeStruct((N, 1, Wo1 * Cm), f32),
            jax.ShapeDtypeStruct((N, 1, Wo1 * Cm), f32),
        ),
        grid=(N,),
        in_specs=[
            pl.BlockSpec((1, H + 1, W1 * Cin), lambda n: (n, 0, 0)),
            pl.BlockSpec((1, H2, W2 * Ch), lambda n: (n, 0, 0)),
            pl.BlockSpec((2, W1 * Cin, W * Ch), lambda n: (0, 0, 0)),
            pl.BlockSpec((3, W2 * Ch, Wo1 * Cm), lambda n: (0, 0, 0)),
            pl.BlockSpec((3, W * Ch, Wo1 * Cm), lambda n: (0, 0, 0)),
            pl.BlockSpec((1, Wo1 * Cm), lambda n: (0, 0)),
        ],
        out_specs=(
            pl.BlockSpec((1, Ho1, Wo1 * Cm), lambda n: (n, 0, 0)),
            pl.BlockSpec((1, 1, Wo1 * Cm), lambda n: (n, 0, 0)),
            pl.BlockSpec((1, 1, Wo1 * Cm), lambda n: (n, 0, 0)),
        ),
        compiler_params=par,
    )(X1p, X2r, M, B1a, B1b, b1r)

    sc1, sh1 = _bn_affine(s1, q1, Wo1, Cm, N * Ho1 * Wo1)

    # ---- pass 2: BN1 + ReLU + conv2 + BN2 partial sums ---------------------
    z2, s2, q2 = pl.pallas_call(
        _bn_relu_conv2_kernel,
        out_shape=(
            jax.ShapeDtypeStruct((N, Ho2, Wo2 * Co), f32),
            jax.ShapeDtypeStruct((N, 1, Wo2 * Co), f32),
            jax.ShapeDtypeStruct((N, 1, Wo2 * Co), f32),
        ),
        grid=(N,),
        in_specs=[
            pl.BlockSpec((1, Ho1, Wo1 * Cm), lambda n: (n, 0, 0)),
            pl.BlockSpec((1, Wo1 * Cm), lambda n: (0, 0)),
            pl.BlockSpec((1, Wo1 * Cm), lambda n: (0, 0)),
            pl.BlockSpec((3, Wo1 * Cm, Wo2 * Co), lambda n: (0, 0, 0)),
            pl.BlockSpec((1, Wo2 * Co), lambda n: (0, 0)),
        ],
        out_specs=(
            pl.BlockSpec((1, Ho2, Wo2 * Co), lambda n: (n, 0, 0)),
            pl.BlockSpec((1, 1, Wo2 * Co), lambda n: (n, 0, 0)),
            pl.BlockSpec((1, 1, Wo2 * Co), lambda n: (n, 0, 0)),
        ),
        compiler_params=par,
    )(z1, sc1, sh1, B2, b2r)

    sc2, sh2 = _bn_affine(s2, q2, Wo2, Co, N * Ho2 * Wo2)

    # ---- pass 3: final BN + ReLU, in place over z2 -------------------------
    out = pl.pallas_call(
        _bn_relu_kernel,
        out_shape=jax.ShapeDtypeStruct((N, Ho2, Wo2 * Co), f32),
        grid=(N,),
        in_specs=[
            pl.BlockSpec((1, Ho2, Wo2 * Co), lambda n: (n, 0, 0)),
            pl.BlockSpec((1, Wo2 * Co), lambda n: (0, 0)),
            pl.BlockSpec((1, Wo2 * Co), lambda n: (0, 0)),
        ],
        out_specs=pl.BlockSpec((1, Ho2, Wo2 * Co), lambda n: (n, 0, 0)),
        input_output_aliases={0: 0},
        compiler_params=par,
    )(z2, sc2, sh2)

    return out.reshape(N, Ho2, Wo2, Co)   # NHWC


# ----------------------------------------------------------------------------
# Pure-JAX reference (independent of the kernels)
# ----------------------------------------------------------------------------
def up_forward_ref(x1, x2, p, eps=1e-5):
    N, H1, W1, Cin = x1.shape
    Ch = Cin // 2
    up = jnp.einsum("nhwc,ijcd->nhiwjd", x1, p["wt"])
    up = up.reshape(N, 2 * H1, 2 * W1, Ch) + p["bt"][None, None, None, :]
    H, W = 2 * H1, 2 * W1
    dY = x2.shape[1] - H
    dX = x2.shape[2] - W
    x2c = x2[:, dY // 2: x2.shape[1] - dY // 2,
             dX // 2: x2.shape[2] - dX // 2, :]
    x = jnp.concatenate([x2c, up], axis=-1)

    def conv(a, w, b):
        return jax.lax.conv_general_dilated(
            a, w, (1, 1), "VALID",
            dimension_numbers=("NHWC", "HWIO", "NHWC")) + b[None, None, None, :]

    def bn_relu(a):
        mean = jnp.mean(a, axis=(0, 1, 2))
        var = jnp.var(a, axis=(0, 1, 2))
        return jnp.maximum((a - mean) * jax.lax.rsqrt(var + eps), 0.0)

    z1 = conv(x, p["w1"], p["b1"])
    z2 = conv(bn_relu(z1), p["w2"], p["b2"])
    return bn_relu(z2)


if __name__ == "__main__":
    key = jax.random.PRNGKey(0)
    ks = jax.random.split(key, 8)

    N, H1, W1 = 2, 8, 8
    Cin, Cout = 8, 4          # Up(in_channels=8, out_channels=4)
    Ch = Cin // 2

    # x1: decoder feature (NHWC). x2: skip connection with Cin//2 channels and
    # larger (even-difference) spatial extent so the center-crop path is used.
    x1 = jax.random.normal(ks[0], (N, H1, W1, Cin), jnp.float32)
    x2 = jax.random.normal(ks[1], (N, 2 * H1 + 4, 2 * W1 + 4, Ch), jnp.float32)

    def xavier(k, shape):
        fan_in = shape[0] * shape[1] * shape[2]
        fan_out = shape[0] * shape[1] * shape[3]
        bound = (6.0 / (fan_in + fan_out)) ** 0.5
        return jax.random.uniform(k, shape, jnp.float32, -bound, bound)

    params = {
        "wt": jax.random.normal(ks[2], (2, 2, Cin, Ch), jnp.float32) * 0.25,
        "bt": jax.random.normal(ks[3], (Ch,), jnp.float32) * 0.05,
        "w1": xavier(ks[4], (3, 3, Cin, Cout)),
        "b1": jax.random.normal(ks[5], (Cout,), jnp.float32) * 0.05,
        "w2": xavier(ks[6], (3, 3, Cout, Cout)),
        "b2": jax.random.normal(ks[7], (Cout,), jnp.float32) * 0.05,
    }

    out = jax.jit(up_forward)(x1, x2, params)
    jax.block_until_ready(out)

    ref = up_forward_ref(x1, x2, params)
    np.testing.assert_allclose(np.asarray(out), np.asarray(ref),
                               rtol=1e-3, atol=1e-3)
    print("KERNEL_OK")
</pallas_src>

<mosaic_0001>
module attributes {stable_mosaic.version = 11 : i64} {
  func.func @_up_conv1_kernel(%arg0: i32, %arg1: memref<1x17x64xf32, #tpu.memory_space<vmem>>, %arg2: memref<1x20x80xf32, #tpu.memory_space<vmem>>, %arg3: memref<2x64x64xf32, #tpu.memory_space<vmem>>, %arg4: memref<3x80x56xf32, #tpu.memory_space<vmem>>, %arg5: memref<3x64x56xf32, #tpu.memory_space<vmem>>, %arg6: memref<1x56xf32, #tpu.memory_space<vmem>>, %arg7: memref<1x14x56xf32, #tpu.memory_space<vmem>>, %arg8: memref<1x1x56xf32, #tpu.memory_space<vmem>>, %arg9: memref<1x1x56xf32, #tpu.memory_space<vmem>>) attributes {dimension_semantics = [#tpu.dimension_semantics<parallel>], iteration_bounds = array<i64: 2>, scalar_prefetch = 0 : i64, scratch_operands = 0 : i64, tpu.core_type = #tpu.core_type<tc>, window_params = [{transform_indices = @transform_0, window_bounds = array<i64: 1, 17, 64>}, {transform_indices = @transform_1, window_bounds = array<i64: 1, 20, 80>}, {pipeline_mode = #tpu.pipeline_mode<synchronous>, transform_indices = @transform_2, window_bounds = array<i64: 2, 64, 64>}, {pipeline_mode = #tpu.pipeline_mode<synchronous>, transform_indices = @transform_3, window_bounds = array<i64: 3, 80, 56>}, {pipeline_mode = #tpu.pipeline_mode<synchronous>, transform_indices = @transform_4, window_bounds = array<i64: 3, 64, 56>}, {pipeline_mode = #tpu.pipeline_mode<synchronous>, transform_indices = @transform_5, window_bounds = array<i64: 1, 56>}, {transform_indices = @transform_6, window_bounds = array<i64: 1, 14, 56>}, {transform_indices = @transform_7, window_bounds = array<i64: 1, 1, 56>}, {transform_indices = @transform_8, window_bounds = array<i64: 1, 1, 56>}]} {
    %c0 = arith.constant 0 : index
    %c0_0 = arith.constant 0 : index
    %c0_1 = arith.constant 0 : index
    %0 = vector.load %arg1[%c0, %c0_0, %c0_1] : memref<1x17x64xf32, #tpu.memory_space<vmem>>, vector<1x17x64xf32>
    %1 = vector.shape_cast %0 : vector<1x17x64xf32> to vector<17x64xf32>
    %2 = vector.extract_strided_slice %1 {offsets = [1, 0], sizes = [16, 64], strides = [1, 1]} : vector<17x64xf32> to vector<16x64xf32>
    %c0_2 = arith.constant 0 : index
    %c0_3 = arith.constant 0 : index
    %c0_4 = arith.constant 0 : index
    %3 = vector.load %arg3[%c0_2, %c0_3, %c0_4] : memref<2x64x64xf32, #tpu.memory_space<vmem>>, vector<1x64x64xf32>
    %4 = vector.shape_cast %3 : vector<1x64x64xf32> to vector<64x64xf32>
    %cst = arith.constant dense<0.000000e+00> : vector<16x64xf32>
    %5 = tpu.matmul %2, %4, %cst {dimension_numbers = #tpu.dot_dimension_numbers<[1], [0], [0], [1], [0, 0, 1, 1], [], []>} : vector<16x64xf32>, vector<64x64xf32>, vector<16x64xf32> -> vector<16x64xf32>
    %6 = vector.extract_strided_slice %1 {offsets = [0, 0], sizes = [16, 64], strides = [1, 1]} : vector<17x64xf32> to vector<16x64xf32>
    %c1 = arith.constant 1 : index
    %c0_5 = arith.constant 0 : index
    %c0_6 = arith.constant 0 : index
    %7 = vector.load %arg3[%c1, %c0_5, %c0_6] : memref<2x64x64xf32, #tpu.memory_space<vmem>>, vector<1x64x64xf32>
    %8 = vector.shape_cast %7 : vector<1x64x64xf32> to vector<64x64xf32>
    %cst_7 = arith.constant dense<0.000000e+00> : vector<16x64xf32>
    %9 = tpu.matmul %6, %8, %cst_7 {dimension_numbers = #tpu.dot_dimension_numbers<[1], [0], [0], [1], [0, 0, 1, 1], [], []>} : vector<16x64xf32>, vector<64x64xf32>, vector<16x64xf32> -> vector<16x64xf32>
    %10 = arith.addf %5, %9 : vector<16x64xf32>
    %cst_8 = arith.constant 0.000000e+00 : f32
    %11 = vector.broadcast %cst_8 : f32 to vector<14x56xf32>
    %c0_9 = arith.constant 0 : index
    %c2 = arith.constant 2 : index
    %c0_10 = arith.constant 0 : index
    %12 = vector.load %arg2[%c0_9, %c2, %c0_10] : memref<1x20x80xf32, #tpu.memory_space<vmem>>, vector<1x14x80xf32>
    %13 = vector.shape_cast %12 : vector<1x14x80xf32> to vector<14x80xf32>
    %c0_11 = arith.constant 0 : index
    %c0_12 = arith.constant 0 : index
    %c0_13 = arith.constant 0 : index
    %14 = vector.load %arg4[%c0_11, %c0_12, %c0_13] : memref<3x80x56xf32, #tpu.memory_space<vmem>>, vector<1x80x56xf32>
    %15 = vector.shape_cast %14 : vector<1x80x56xf32> to vector<80x56xf32>
    %cst_14 = arith.constant dense<0.000000e+00> : vector<14x56xf32>
    %16 = tpu.matmul %13, %15, %cst_14 {dimension_numbers = #tpu.dot_dimension_numbers<[1], [0], [0], [1], [0, 0, 1, 1], [], []>} : vector<14x80xf32>, vector<80x56xf32>, vector<14x56xf32> -> vector<14x56xf32>
    %17 = arith.addf %11, %16 : vector<14x56xf32>
    %18 = vector.extract_strided_slice %10 {offsets = [0, 0], sizes = [14, 64], strides = [1, 1]} : vector<16x64xf32> to vector<14x64xf32>
    %c0_15 = arith.constant 0 : index
    %c0_16 = arith.constant 0 : index
    %c0_17 = arith.constant 0 : index
    %19 = vector.load %arg5[%c0_15, %c0_16, %c0_17] : memref<3x64x56xf32, #tpu.memory_space<vmem>>, vector<1x64x56xf32>
    %20 = vector.shape_cast %19 : vector<1x64x56xf32> to vector<64x56xf32>
    %cst_18 = arith.constant dense<0.000000e+00> : vector<14x56xf32>
    %21 = tpu.matmul %18, %20, %cst_18 {dimension_numbers = #tpu.dot_dimension_numbers<[1], [0], [0], [1], [0, 0, 1, 1], [], []>} : vector<14x64xf32>, vector<64x56xf32>, vector<14x56xf32> -> vector<14x56xf32>
    %22 = arith.addf %17, %21 : vector<14x56xf32>
    %c0_19 = arith.constant 0 : index
    %c3 = arith.constant 3 : index
    %c0_20 = arith.constant 0 : index
    %23 = vector.load %arg2[%c0_19, %c3, %c0_20] : memref<1x20x80xf32, #tpu.memory_space<vmem>>, vector<1x14x80xf32>
    %24 = vector.shape_cast %23 : vector<1x14x80xf32> to vector<14x80xf32>
    %c1_21 = arith.constant 1 : index
    %c0_22 = arith.constant 0 : index
    %c0_23 = arith.constant 0 : index
    %25 = vector.load %arg4[%c1_21, %c0_22, %c0_23] : memref<3x80x56xf32, #tpu.memory_space<vmem>>, vector<1x80x56xf32>
    %26 = vector.shape_cast %25 : vector<1x80x56xf32> to vector<80x56xf32>
    %cst_24 = arith.constant dense<0.000000e+00> : vector<14x56xf32>
    %27 = tpu.matmul %24, %26, %cst_24 {dimension_numbers = #tpu.dot_dimension_numbers<[1], [0], [0], [1], [0, 0, 1, 1], [], []>} : vector<14x80xf32>, vector<80x56xf32>, vector<14x56xf32> -> vector<14x56xf32>
    %28 = arith.addf %22, %27 : vector<14x56xf32>
    %29 = vector.extract_strided_slice %10 {offsets = [1, 0], sizes = [14, 64], strides = [1, 1]} : vector<16x64xf32> to vector<14x64xf32>
    %c1_25 = arith.constant 1 : index
    %c0_26 = arith.constant 0 : index
    %c0_27 = arith.constant 0 : index
    %30 = vector.load %arg5[%c1_25, %c0_26, %c0_27] : memref<3x64x56xf32, #tpu.memory_space<vmem>>, vector<1x64x56xf32>
    %31 = vector.shape_cast %30 : vector<1x64x56xf32> to vector<64x56xf32>
    %cst_28 = arith.constant dense<0.000000e+00> : vector<14x56xf32>
    %32 = tpu.matmul %29, %31, %cst_28 {dimension_numbers = #tpu.dot_dimension_numbers<[1], [0], [0], [1], [0, 0, 1, 1], [], []>} : vector<14x64xf32>, vector<64x56xf32>, vector<14x56xf32> -> vector<14x56xf32>
    %33 = arith.addf %28, %32 : vector<14x56xf32>
    %c0_29 = arith.constant 0 : index
    %c4 = arith.constant 4 : index
    %c0_30 = arith.constant 0 : index
    %34 = vector.load %arg2[%c0_29, %c4, %c0_30] : memref<1x20x80xf32, #tpu.memory_space<vmem>>, vector<1x14x80xf32>
    %35 = vector.shape_cast %34 : vector<1x14x80xf32> to vector<14x80xf32>
    %c2_31 = arith.constant 2 : index
    %c0_32 = arith.constant 0 : index
    %c0_33 = arith.constant 0 : index
    %36 = vector.load %arg4[%c2_31, %c0_32, %c0_33] : memref<3x80x56xf32, #tpu.memory_space<vmem>>, vector<1x80x56xf32>
    %37 = vector.shape_cast %36 : vector<1x80x56xf32> to vector<80x56xf32>
    %cst_34 = arith.constant dense<0.000000e+00> : vector<14x56xf32>
    %38 = tpu.matmul %35, %37, %cst_34 {dimension_numbers = #tpu.dot_dimension_numbers<[1], [0], [0], [1], [0, 0, 1, 1], [], []>} : vector<14x80xf32>, vector<80x56xf32>, vector<14x56xf32> -> vector<14x56xf32>
    %39 = arith.addf %33, %38 : vector<14x56xf32>
    %40 = vector.extract_strided_slice %10 {offsets = [2, 0], sizes = [14, 64], strides = [1, 1]} : vector<16x64xf32> to vector<14x64xf32>
    %c2_35 = arith.constant 2 : index
    %c0_36 = arith.constant 0 : index
    %c0_37 = arith.constant 0 : index
    %41 = vector.load %arg5[%c2_35, %c0_36, %c0_37] : memref<3x64x56xf32, #tpu.memory_space<vmem>>, vector<1x64x56xf32>
    %42 = vector.shape_cast %41 : vector<1x64x56xf32> to vector<64x56xf32>
    %cst_38 = arith.constant dense<0.000000e+00> : vector<14x56xf32>
    %43 = tpu.matmul %40, %42, %cst_38 {dimension_numbers = #tpu.dot_dimension_numbers<[1], [0], [0], [1], [0, 0, 1, 1], [], []>} : vector<14x64xf32>, vector<64x56xf32>, vector<14x56xf32> -> vector<14x56xf32>
    %44 = arith.addf %39, %43 : vector<14x56xf32>
    %c0_39 = arith.constant 0 : index
    %c0_40 = arith.constant 0 : index
    %45 = vector.load %arg6[%c0_39, %c0_40] : memref<1x56xf32, #tpu.memory_space<vmem>>, vector<1x56xf32>
    %46 = vector.broadcast %45 : vector<1x56xf32> to vector<14x56xf32>
    %47 = arith.addf %44, %46 : vector<14x56xf32>
    %c0_41 = arith.constant 0 : index
    %c0_42 = arith.constant 0 : index
    %c0_43 = arith.constant 0 : index
    %48 = vector.load %arg7[%c0_41, %c0_42, %c0_43] : memref<1x14x56xf32, #tpu.memory_space<vmem>>, vector<1x14x56xf32>
    %49 = vector.shape_cast %48 : vector<1x14x56xf32> to vector<14x56xf32>
    %50 = vector.shape_cast %47 : vector<14x56xf32> to vector<1x14x56xf32>
    tpu.vector_store %arg7[%c0_41, %c0_42, %c0_43], %50 {strides = array<i32>} : memref<1x14x56xf32, #tpu.memory_space<vmem>>, vector<1x14x56xf32>,
    %cst_44 = arith.constant dense<0.000000e+00> : vector<56xf32>
    %51 = vector.multi_reduction <add>, %47, %cst_44 [0] : vector<14x56xf32> to vector<56xf32>
    %52 = vector.shape_cast %51 : vector<56xf32> to vector<1x56xf32>
    %c0_45 = arith.constant 0 : index
    %c0_46 = arith.constant 0 : index
    %c0_47 = arith.constant 0 : index
    %53 = vector.load %arg8[%c0_45, %c0_46, %c0_47] : memref<1x1x56xf32, #tpu.memory_space<vmem>>, vector<1x1x56xf32>
    %54 = vector.shape_cast %53 : vector<1x1x56xf32> to vector<1x56xf32>
    %55 = vector.shape_cast %52 : vector<1x56xf32> to vector<1x1x56xf32>
    tpu.vector_store %arg8[%c0_45, %c0_46, %c0_47], %55 {strides = array<i32>} : memref<1x1x56xf32, #tpu.memory_space<vmem>>, vector<1x1x56xf32>,
    %56 = arith.mulf %47, %47 : vector<14x56xf32>
    %cst_48 = arith.constant dense<0.000000e+00> : vector<56xf32>
    %57 = vector.multi_reduction <add>, %56, %cst_48 [0] : vector<14x56xf32> to vector<56xf32>
    %58 = vector.shape_cast %57 : vector<56xf32> to vector<1x56xf32>
    %c0_49 = arith.constant 0 : index
    %c0_50 = arith.constant 0 : index
    %c0_51 = arith.constant 0 : index
    %59 = vector.load %arg9[%c0_49, %c0_50, %c0_51] : memref<1x1x56xf32, #tpu.memory_space<vmem>>, vector<1x1x56xf32>
    %60 = vector.shape_cast %59 : vector<1x1x56xf32> to vector<1x56xf32>
    %61 = vector.shape_cast %58 : vector<1x56xf32> to vector<1x1x56xf32>
    tpu.vector_store %arg9[%c0_49, %c0_50, %c0_51], %61 {strides = array<i32>} : memref<1x1x56xf32, #tpu.memory_space<vmem>>, vector<1x1x56xf32>,
    return
  }
  func.func @transform_0(%arg0: i32) -> (i32, i32, i32) {
    %c0_i32 = arith.constant 0 : i32
    %c0_i32_0 = arith.constant 0 : i32
    %c0_i32_1 = arith.constant 0 : i32
    return %arg0, %c0_i32, %c0_i32_0 : i32, i32, i32
  }
  func.func @transform_1(%arg0: i32) -> (i32, i32, i32) {
    %c0_i32 = arith.constant 0 : i32
    %c0_i32_0 = arith.constant 0 : i32
    %c0_i32_1 = arith.constant 0 : i32
    return %arg0, %c0_i32, %c0_i32_0 : i32, i32, i32
  }
  func.func @transform_2(%arg0: i32) -> (i32, i32, i32) {
    %c0_i32 = arith.constant 0 : i32
    %c0_i32_0 = arith.constant 0 : i32
    %c0_i32_1 = arith.constant 0 : i32
    %c0_i32_2 = arith.constant 0 : i32
    return %c0_i32, %c0_i32_0, %c0_i32_1 : i32, i32, i32
  }
  func.func @transform_3(%arg0: i32) -> (i32, i32, i32) {
    %c0_i32 = arith.constant 0 : i32
    %c0_i32_0 = arith.constant 0 : i32
    %c0_i32_1 = arith.constant 0 : i32
    %c0_i32_2 = arith.constant 0 : i32
    return %c0_i32, %c0_i32_0, %c0_i32_1 : i32, i32, i32
  }
  func.func @transform_4(%arg0: i32) -> (i32, i32, i32) {
    %c0_i32 = arith.constant 0 : i32
    %c0_i32_0 = arith.constant 0 : i32
    %c0_i32_1 = arith.constant 0 : i32
    %c0_i32_2 = arith.constant 0 : i32
    return %c0_i32, %c0_i32_0, %c0_i32_1 : i32, i32, i32
  }
  func.func @transform_5(%arg0: i32) -> (i32, i32) {
    %c0_i32 = arith.constant 0 : i32
    %c0_i32_0 = arith.constant 0 : i32
    %c0_i32_1 = arith.constant 0 : i32
    return %c0_i32, %c0_i32_0 : i32, i32
  }
  func.func @transform_6(%arg0: i32) -> (i32, i32, i32) {
    %c0_i32 = arith.constant 0 : i32
    %c0_i32_0 = arith.constant 0 : i32
    %c0_i32_1 = arith.constant 0 : i32
    return %arg0, %c0_i32, %c0_i32_0 : i32, i32, i32
  }
  func.func @transform_7(%arg0: i32) -> (i32, i32, i32) {
    %c0_i32 = arith.constant 0 : i32
    %c0_i32_0 = arith.constant 0 : i32
    %c0_i32_1 = arith.constant 0 : i32
    return %arg0, %c0_i32, %c0_i32_0 : i32, i32, i32
  }
  func.func @transform_8(%arg0: i32) -> (i32, i32, i32) {
    %c0_i32 = arith.constant 0 : i32
    %c0_i32_0 = arith.constant 0 : i32
    %c0_i32_1 = arith.constant 0 : i32
    return %arg0, %c0_i32, %c0_i32_0 : i32, i32, i32
  }
}

module attributes {stable_mosaic.version = 11 : i64} {
  func.func @_bn_relu_conv2_kernel(%arg0: i32, %arg1: memref<1x14x56xf32, #tpu.memory_space<vmem>>, %arg2: memref<1x56xf32, #tpu.memory_space<vmem>>, %arg3: memref<1x56xf32, #tpu.memory_space<vmem>>, %arg4: memref<3x56x48xf32, #tpu.memory_space<vmem>>, %arg5: memref<1x48xf32, #tpu.memory_space<vmem>>, %arg6: memref<1x12x48xf32, #tpu.memory_space<vmem>>, %arg7: memref<1x1x48xf32, #tpu.memory_space<vmem>>, %arg8: memref<1x1x48xf32, #tpu.memory_space<vmem>>) attributes {dimension_semantics = [#tpu.dimension_semantics<parallel>], iteration_bounds = array<i64: 2>, scalar_prefetch = 0 : i64, scratch_operands = 0 : i64, tpu.core_type = #tpu.core_type<tc>, window_params = [{transform_indices = @transform_0, window_bounds = array<i64: 1, 14, 56>}, {pipeline_mode = #tpu.pipeline_mode<synchronous>, transform_indices = @transform_1, window_bounds = array<i64: 1, 56>}, {pipeline_mode = #tpu.pipeline_mode<synchronous>, transform_indices = @transform_2, window_bounds = array<i64: 1, 56>}, {pipeline_mode = #tpu.pipeline_mode<synchronous>, transform_indices = @transform_3, window_bounds = array<i64: 3, 56, 48>}, {pipeline_mode = #tpu.pipeline_mode<synchronous>, transform_indices = @transform_4, window_bounds = array<i64: 1, 48>}, {transform_indices = @transform_5, window_bounds = array<i64: 1, 12, 48>}, {transform_indices = @transform_6, window_bounds = array<i64: 1, 1, 48>}, {transform_indices = @transform_7, window_bounds = array<i64: 1, 1, 48>}]} {
    %c0 = arith.constant 0 : index
    %c0_0 = arith.constant 0 : index
    %c0_1 = arith.constant 0 : index
    %0 = vector.load %arg1[%c0, %c0_0, %c0_1] : memref<1x14x56xf32, #tpu.memory_space<vmem>>, vector<1x14x56xf32>
    %1 = vector.shape_cast %0 : vector<1x14x56xf32> to vector<14x56xf32>
    %c0_2 = arith.constant 0 : index
    %c0_3 = arith.constant 0 : index
    %2 = vector.load %arg2[%c0_2, %c0_3] : memref<1x56xf32, #tpu.memory_space<vmem>>, vector<1x56xf32>
    %3 = vector.broadcast %2 : vector<1x56xf32> to vector<14x56xf32>
    %4 = arith.mulf %1, %3 : vector<14x56xf32>
    %c0_4 = arith.constant 0 : index
    %c0_5 = arith.constant 0 : index
    %5 = vector.load %arg3[%c0_4, %c0_5] : memref<1x56xf32, #tpu.memory_space<vmem>>, vector<1x56xf32>
    %6 = vector.broadcast %5 : vector<1x56xf32> to vector<14x56xf32>
    %7 = arith.addf %4, %6 : vector<14x56xf32>
    %cst = arith.constant 0.000000e+00 : f32
    %8 = vector.broadcast %cst : f32 to vector<14x56xf32>
    %9 = arith.maximumf %7, %8 : vector<14x56xf32>
    %cst_6 = arith.constant 0.000000e+00 : f32
    %10 = vector.broadcast %cst_6 : f32 to vector<12x48xf32>
    %11 = vector.extract_strided_slice %9 {offsets = [0, 0], sizes = [12, 56], strides = [1, 1]} : vector<14x56xf32> to vector<12x56xf32>
    %c0_7 = arith.constant 0 : index
    %c0_8 = arith.constant 0 : index
    %c0_9 = arith.constant 0 : index
    %12 = vector.load %arg4[%c0_7, %c0_8, %c0_9] : memref<3x56x48xf32, #tpu.memory_space<vmem>>, vector<1x56x48xf32>
    %13 = vector.shape_cast %12 : vector<1x56x48xf32> to vector<56x48xf32>
    %cst_10 = arith.constant dense<0.000000e+00> : vector<12x48xf32>
    %14 = tpu.matmul %11, %13, %cst_10 {dimension_numbers = #tpu.dot_dimension_numbers<[1], [0], [0], [1], [0, 0, 1, 1], [], []>} : vector<12x56xf32>, vector<56x48xf32>, vector<12x48xf32> -> vector<12x48xf32>
    %15 = arith.addf %10, %14 : vector<12x48xf32>
    %16 = vector.extract_strided_slice %9 {offsets = [1, 0], sizes = [12, 56], strides = [1, 1]} : vector<14x56xf32> to vector<12x56xf32>
    %c1 = arith.constant 1 : index
    %c0_11 = arith.constant 0 : index
    %c0_12 = arith.constant 0 : index
    %17 = vector.load %arg4[%c1, %c0_11, %c0_12] : memref<3x56x48xf32, #tpu.memory_space<vmem>>, vector<1x56x48xf32>
    %18 = vector.shape_cast %17 : vector<1x56x48xf32> to vector<56x48xf32>
    %cst_13 = arith.constant dense<0.000000e+00> : vector<12x48xf32>
    %19 = tpu.matmul %16, %18, %cst_13 {dimension_numbers = #tpu.dot_dimension_numbers<[1], [0], [0], [1], [0, 0, 1, 1], [], []>} : vector<12x56xf32>, vector<56x48xf32>, vector<12x48xf32> -> vector<12x48xf32>
    %20 = arith.addf %15, %19 : vector<12x48xf32>
    %21 = vector.extract_strided_slice %9 {offsets = [2, 0], sizes = [12, 56], strides = [1, 1]} : vector<14x56xf32> to vector<12x56xf32>
    %c2 = arith.constant 2 : index
    %c0_14 = arith.constant 0 : index
    %c0_15 = arith.constant 0 : index
    %22 = vector.load %arg4[%c2, %c0_14, %c0_15] : memref<3x56x48xf32, #tpu.memory_space<vmem>>, vector<1x56x48xf32>
    %23 = vector.shape_cast %22 : vector<1x56x48xf32> to vector<56x48xf32>
    %cst_16 = arith.constant dense<0.000000e+00> : vector<12x48xf32>
    %24 = tpu.matmul %21, %23, %cst_16 {dimension_numbers = #tpu.dot_dimension_numbers<[1], [0], [0], [1], [0, 0, 1, 1], [], []>} : vector<12x56xf32>, vector<56x48xf32>, vector<12x48xf32> -> vector<12x48xf32>
    %25 = arith.addf %20, %24 : vector<12x48xf32>
    %c0_17 = arith.constant 0 : index
    %c0_18 = arith.constant 0 : index
    %26 = vector.load %arg5[%c0_17, %c0_18] : memref<1x48xf32, #tpu.memory_space<vmem>>, vector<1x48xf32>
    %27 = vector.broadcast %26 : vector<1x48xf32> to vector<12x48xf32>
    %28 = arith.addf %25, %27 : vector<12x48xf32>
    %c0_19 = arith.constant 0 : index
    %c0_20 = arith.constant 0 : index
    %c0_21 = arith.constant 0 : index
    %29 = vector.load %arg6[%c0_19, %c0_20, %c0_21] : memref<1x12x48xf32, #tpu.memory_space<vmem>>, vector<1x12x48xf32>
    %30 = vector.shape_cast %29 : vector<1x12x48xf32> to vector<12x48xf32>
    %31 = vector.shape_cast %28 : vector<12x48xf32> to vector<1x12x48xf32>
    tpu.vector_store %arg6[%c0_19, %c0_20, %c0_21], %31 {strides = array<i32>} : memref<1x12x48xf32, #tpu.memory_space<vmem>>, vector<1x12x48xf32>,
    %cst_22 = arith.constant dense<0.000000e+00> : vector<48xf32>
    %32 = vector.multi_reduction <add>, %28, %cst_22 [0] : vector<12x48xf32> to vector<48xf32>
    %33 = vector.shape_cast %32 : vector<48xf32> to vector<1x48xf32>
    %c0_23 = arith.constant 0 : index
    %c0_24 = arith.constant 0 : index
    %c0_25 = arith.constant 0 : index
    %34 = vector.load %arg7[%c0_23, %c0_24, %c0_25] : memref<1x1x48xf32, #tpu.memory_space<vmem>>, vector<1x1x48xf32>
    %35 = vector.shape_cast %34 : vector<1x1x48xf32> to vector<1x48xf32>
    %36 = vector.shape_cast %33 : vector<1x48xf32> to vector<1x1x48xf32>
    tpu.vector_store %arg7[%c0_23, %c0_24, %c0_25], %36 {strides = array<i32>} : memref<1x1x48xf32, #tpu.memory_space<vmem>>, vector<1x1x48xf32>,
    %37 = arith.mulf %28, %28 : vector<12x48xf32>
    %cst_26 = arith.constant dense<0.000000e+00> : vector<48xf32>
    %38 = vector.multi_reduction <add>, %37, %cst_26 [0] : vector<12x48xf32> to vector<48xf32>
    %39 = vector.shape_cast %38 : vector<48xf32> to vector<1x48xf32>
    %c0_27 = arith.constant 0 : index
    %c0_28 = arith.constant 0 : index
    %c0_29 = arith.constant 0 : index
    %40 = vector.load %arg8[%c0_27, %c0_28, %c0_29] : memref<1x1x48xf32, #tpu.memory_space<vmem>>, vector<1x1x48xf32>
    %41 = vector.shape_cast %40 : vector<1x1x48xf32> to vector<1x48xf32>
    %42 = vector.shape_cast %39 : vector<1x48xf32> to vector<1x1x48xf32>
    tpu.vector_store %arg8[%c0_27, %c0_28, %c0_29], %42 {strides = array<i32>} : memref<1x1x48xf32, #tpu.memory_space<vmem>>, vector<1x1x48xf32>,
    return
  }
  func.func @transform_0(%arg0: i32) -> (i32, i32, i32) {
    %c0_i32 = arith.constant 0 : i32
    %c0_i32_0 = arith.constant 0 : i32
    %c0_i32_1 = arith.constant 0 : i32
    return %arg0, %c0_i32, %c0_i32_0 : i32, i32, i32
  }
  func.func @transform_1(%arg0: i32) -> (i32, i32) {
    %c0_i32 = arith.constant 0 : i32
    %c0_i32_0 = arith.constant 0 : i32
    %c0_i32_1 = arith.constant 0 : i32
    return %c0_i32, %c0_i32_0 : i32, i32
  }
  func.func @transform_2(%arg0: i32) -> (i32, i32) {
    %c0_i32 = arith.constant 0 : i32
    %c0_i32_0 = arith.constant 0 : i32
    %c0_i32_1 = arith.constant 0 : i32
    return %c0_i32, %c0_i32_0 : i32, i32
  }
  func.func @transform_3(%arg0: i32) -> (i32, i32, i32) {
    %c0_i32 = arith.constant 0 : i32
    %c0_i32_0 = arith.constant 0 : i32
    %c0_i32_1 = arith.constant 0 : i32
    %c0_i32_2 = arith.constant 0 : i32
    return %c0_i32, %c0_i32_0, %c0_i32_1 : i32, i32, i32
  }
  func.func @transform_4(%arg0: i32) -> (i32, i32) {
    %c0_i32 = arith.constant 0 : i32
    %c0_i32_0 = arith.constant 0 : i32
    %c0_i32_1 = arith.constant 0 : i32
    return %c0_i32, %c0_i32_0 : i32, i32
  }
  func.func @transform_5(%arg0: i32) -> (i32, i32, i32) {
    %c0_i32 = arith.constant 0 : i32
    %c0_i32_0 = arith.constant 0 : i32
    %c0_i32_1 = arith.constant 0 : i32
    return %arg0, %c0_i32, %c0_i32_0 : i32, i32, i32
  }
  func.func @transform_6(%arg0: i32) -> (i32, i32, i32) {
    %c0_i32 = arith.constant 0 : i32
    %c0_i32_0 = arith.constant 0 : i32
    %c0_i32_1 = arith.constant 0 : i32
    return %arg0, %c0_i32, %c0_i32_0 : i32, i32, i32
  }
  func.func @transform_7(%arg0: i32) -> (i32, i32, i32) {
    %c0_i32 = arith.constant 0 : i32
    %c0_i32_0 = arith.constant 0 : i32
    %c0_i32_1 = arith.constant 0 : i32
    return %arg0, %c0_i32, %c0_i32_0 : i32, i32, i32
  }
}

module attributes {stable_mosaic.version = 11 : i64} {
  func.func @_bn_relu_kernel(%arg0: i32, %arg1: memref<1x12x48xf32, #tpu.memory_space<vmem>>, %arg2: memref<1x48xf32, #tpu.memory_space<vmem>>, %arg3: memref<1x48xf32, #tpu.memory_space<vmem>>, %arg4: memref<1x12x48xf32, #tpu.memory_space<vmem>>) attributes {dimension_semantics = [#tpu.dimension_semantics<parallel>], iteration_bounds = array<i64: 2>, scalar_prefetch = 0 : i64, scratch_operands = 0 : i64, tpu.core_type = #tpu.core_type<tc>, window_params = [{transform_indices = @transform_0, window_bounds = array<i64: 1, 12, 48>}, {pipeline_mode = #tpu.pipeline_mode<synchronous>, transform_indices = @transform_1, window_bounds = array<i64: 1, 48>}, {pipeline_mode = #tpu.pipeline_mode<synchronous>, transform_indices = @transform_2, window_bounds = array<i64: 1, 48>}, {transform_indices = @transform_3, window_bounds = array<i64: 1, 12, 48>}]} {
    %c0 = arith.constant 0 : index
    %c0_0 = arith.constant 0 : index
    %c0_1 = arith.constant 0 : index
    %0 = vector.load %arg1[%c0, %c0_0, %c0_1] : memref<1x12x48xf32, #tpu.memory_space<vmem>>, vector<1x12x48xf32>
    %1 = vector.shape_cast %0 : vector<1x12x48xf32> to vector<12x48xf32>
    %c0_2 = arith.constant 0 : index
    %c0_3 = arith.constant 0 : index
    %2 = vector.load %arg2[%c0_2, %c0_3] : memref<1x48xf32, #tpu.memory_space<vmem>>, vector<1x48xf32>
    %3 = vector.broadcast %2 : vector<1x48xf32> to vector<12x48xf32>
    %4 = arith.mulf %1, %3 : vector<12x48xf32>
    %c0_4 = arith.constant 0 : index
    %c0_5 = arith.constant 0 : index
    %5 = vector.load %arg3[%c0_4, %c0_5] : memref<1x48xf32, #tpu.memory_space<vmem>>, vector<1x48xf32>
    %6 = vector.broadcast %5 : vector<1x48xf32> to vector<12x48xf32>
    %7 = arith.addf %4, %6 : vector<12x48xf32>
    %cst = arith.constant 0.000000e+00 : f32
    %8 = vector.broadcast %cst : f32 to vector<12x48xf32>
    %9 = arith.maximumf %7, %8 : vector<12x48xf32>
    %c0_6 = arith.constant 0 : index
    %c0_7 = arith.constant 0 : index
    %c0_8 = arith.constant 0 : index
    %10 = vector.load %arg4[%c0_6, %c0_7, %c0_8] : memref<1x12x48xf32, #tpu.memory_space<vmem>>, vector<1x12x48xf32>
    %11 = vector.shape_cast %10 : vector<1x12x48xf32> to vector<12x48xf32>
    %12 = vector.shape_cast %9 : vector<12x48xf32> to vector<1x12x48xf32>
    tpu.vector_store %arg4[%c0_6, %c0_7, %c0_8], %12 {strides = array<i32>} : memref<1x12x48xf32, #tpu.memory_space<vmem>>, vector<1x12x48xf32>,
    return
  }
  func.func @transform_0(%arg0: i32) -> (i32, i32, i32) {
    %c0_i32 = arith.constant 0 : i32
    %c0_i32_0 = arith.constant 0 : i32
    %c0_i32_1 = arith.constant 0 : i32
    return %arg0, %c0_i32, %c0_i32_0 : i32, i32, i32
  }
  func.func @transform_1(%arg0: i32) -> (i32, i32) {
    %c0_i32 = arith.constant 0 : i32
    %c0_i32_0 = arith.constant 0 : i32
    %c0_i32_1 = arith.constant 0 : i32
    return %c0_i32, %c0_i32_0 : i32, i32
  }
  func.func @transform_2(%arg0: i32) -> (i32, i32) {
    %c0_i32 = arith.constant 0 : i32
    %c0_i32_0 = arith.constant 0 : i32
    %c0_i32_1 = arith.constant 0 : i32
    return %c0_i32, %c0_i32_0 : i32, i32
  }
  func.func @transform_3(%arg0: i32) -> (i32, i32, i32) {
    %c0_i32 = arith.constant 0 : i32
    %c0_i32_0 = arith.constant 0 : i32
    %c0_i32_1 = arith.constant 0 : i32
    return %arg0, %c0_i32, %c0_i32_0 : i32, i32, i32
  }
}

</mosaic_0001>

<bundles_post_ra>
// kernel: tile.43
= control target key start
LH: loop header
LB: loop body
LE: loop exit
PB: predicated region body
PF: predicated region fallthrough
CT: control target
= control target key end

     0   :  { %s28_s0 = inlined_call_operand.vmem [shape: f32[4], index: 0, kind: input, shape index: {}]   ;;  %s29_s1 = inlined_call_operand.vmem [shape: f32[14,4], index: 1, kind: output, shape index: {}]  }
   0x1   :  { %v4_v0 = vld [vmem:[%s28_s0] ss:$0 sm:$0xff] }
   0x2   :  { %5 = vst [vmem:[%s29_s1] sm:$0xff] %v4_v0 }
   0x3   :  { %8 = vst [vmem:[%s29_s1 + $0x8] sm:$0xff] %v4_v0 }

// kernel: tile.44
= control target key start
LH: loop header
LB: loop body
LE: loop exit
PB: predicated region body
PF: predicated region fallthrough
CT: control target
= control target key end

     0   :  { %s115_s10 = smov 52   ;;  %s116_s11 = smov 44   ;;  %vm3_vm0 = vcmask 31744   ;;  %vm9_vm1 = vcmask 458144   ;;  %vm15_vm2 = vcmask 425344   ;;  %vm21_vm3 = vcmask 392544   ;;  %s183_s0 = inlined_call_operand.vmem [shape: f32[14,4], index: 0, kind: input, shape index: {}]   ;;  %s184_s1 = inlined_call_operand.vmem [shape: f32[1,56], index: 1, kind: output, shape index: {}]  }
   0x1   :  { %v89_v0 = vld [vmem:[%s183_s0 + $0xd] sm:$0x1]   ;;  %v91_v1 = vld [vmem:[%s183_s0 + $0xb] sm:$0x1]   ;;  %v93_v2 = vld [vmem:[%s183_s0 + $0x9] sm:$0x1]  }
   0x2   :  { %7 = vrot.lane.b32.xlu0 %v89_v0, %s115_s10  ;;  %19 = vrot.lane.b32.xlu1 %v91_v1, %s116_s11  ;;  %s117_s14 = smov 36   ;;  %v90_v3 = vld [vmem:[%s183_s0 + $0xc] sm:$0x1]   ;;  %v92_v4 = vld [vmem:[%s183_s0 + $0xa] sm:$0x1]   ;;  %s118_s19 = smov 48  }
   0x3   :  { %31 = vrot.lane.b32.xlu2 %v93_v2, %s117_s14  ;;  %s119_s20 = smov 40   ;;  %v94_v5 = vld [vmem:[%s183_s0 + $0x8] sm:$0x1]   ;;  %s120_s23 = smov 32   ;;  %v95_v6 = vld [vmem:[%s183_s0 + $0x7] sm:$0x1]  }
   0x4   :  { %v96_v7 = vld [vmem:[%s183_s0 + $0x6] sm:$0x1]   ;;  %s121_s28 = smov 28   ;;  %s122_s29 = smov 24   ;;  %v97_v8 = vld [vmem:[%s183_s0 + $0x5] sm:$0x1]  }
   0x5   :  { %s123_s3 = smov 20   ;;  %v98_v9 = vld [vmem:[%s183_s0 + $0x4] sm:$0x1]   ;;  %v99_v10 = vld [vmem:[%s183_s0 + $0x3] sm:$0x1]   ;;  %s124_s8 = smov 16  }
   0x6   :  { %s125_s9 = smov 12   ;;  %v100_v11 = vld [vmem:[%s183_s0 + $0x2] sm:$0x1]   ;;  %s126_s12 = smov 8   ;;  %v101_v12 = vld [vmem:[%s183_s0 + $0x1] sm:$0x1]  }
   0x7   :  { %s127_s15 = smov 4   ;;  %v2_v13 = vld [vmem:[%s183_s0] sm:$0x1]   ;;  %vm27_vm4 = vcmask 359744   ;;  %vm33_vm5 = vcmask 326944   ;;  %vm39_vm6 = vcmask 294144  }
   0x8   :  { %4 = vst.msk [vmem:[#allocation0] sm:$0x1] %vm3_vm0, %v2_v13   ;;  %vm45_vm7 = vcmask 261344   ;;  %vm51_vm8 = vcmask 228544   ;;  %vm57_vm9 = vcmask 195744   ;;  %vm63_vm10 = vcmask 162944  }
   0x9   :  { %vm69_vm11 = vcmask 130144   ;;  %vm75_vm12 = vcmask 97344   ;;  %vm81_vm13 = vcmask 64544  }
   0xa   :  { %13 = vrot.lane.b32.xlu0 %v90_v3, %s118_s19  ;;  %25 = vrot.lane.b32.xlu1 %v92_v4, %s119_s20 }
   0xb   :  { %37 = vrot.lane.b32.xlu2 %v94_v5, %s120_s23 }
  0x12   :  { %43 = vrot.lane.b32.xlu0 %v95_v6, %s121_s28  ;;  %49 = vrot.lane.b32.xlu1 %v96_v7, %s122_s29 }
  0x13   :  { %55 = vrot.lane.b32.xlu2 %v97_v8, %s123_s3 }
  0x1a   :  { %61 = vrot.lane.b32.xlu0 %v98_v9, %s124_s8  ;;  %67 = vrot.lane.b32.xlu1 %v99_v10, %s125_s9 }
  0x1b   :  { %73 = vrot.lane.b32.xlu2 %v100_v11, %s126_s12 }
  0x22   :  { %79 = vrot.lane.b32.xlu0 %v101_v12, %s127_s15 }
  0x5d   :  { %v32_v14 = vpop.permute.xlu2 %31  }
  0x65   :  { %v38_v15 = vpop.permute.xlu2 %37  }
  0x6d   :  { %v56_v16 = vpop.permute.xlu2 %55  }
  0x74   :  { %v8_v17 = vpop.permute.xlu0 %7   ;;  %v20_v18 = vpop.permute.xlu1 %19  }
  0x75   :  { %10 = vst.msk [vmem:[#allocation0] sm:$0x1] %vm9_vm1, %v8_v17   ;;  %v74_v19 = vpop.permute.xlu2 %73  }
  0x7c   :  { %v14_v20 = vpop.permute.xlu0 %13   ;;  %v26_v21 = vpop.permute.xlu1 %25  }
  0x7d   :  { %16 = vst.msk [vmem:[#allocation0] sm:$0x1] %vm15_vm2, %v14_v20  }
  0x7e   :  { %22 = vst.msk [vmem:[#allocation0] sm:$0x1] %vm21_vm3, %v20_v18  }
  0x7f   :  { %28 = vst.msk [vmem:[#allocation0] sm:$0x1] %vm27_vm4, %v26_v21  }
  0x80   :  { %34 = vst.msk [vmem:[#allocation0] sm:$0x1] %vm33_vm5, %v32_v14  }
  0x81   :  { %40 = vst.msk [vmem:[#allocation0] sm:$0x1] %vm39_vm6, %v38_v15  }
  0x84   :  { %v44_v22 = vpop.permute.xlu0 %43   ;;  %v50_v23 = vpop.permute.xlu1 %49  }
  0x85   :  { %46 = vst.msk [vmem:[#allocation0] sm:$0x1] %vm45_vm7, %v44_v22  }
  0x86   :  { %52 = vst.msk [vmem:[#allocation0] sm:$0x1] %vm51_vm8, %v50_v23  }
  0x87   :  { %58 = vst.msk [vmem:[#allocation0] sm:$0x1] %vm57_vm9, %v56_v16  }
  0x8c   :  { %v62_v24 = vpop.permute.xlu0 %61   ;;  %v68_v25 = vpop.permute.xlu1 %67  }
  0x8d   :  { %64 = vst.msk [vmem:[#allocation0] sm:$0x1] %vm63_vm10, %v62_v24  }
  0x8e   :  { %70 = vst.msk [vmem:[#allocation0] sm:$0x1] %vm69_vm11, %v68_v25  }
  0x8f   :  { %76 = vst.msk [vmem:[#allocation0] sm:$0x1] %vm75_vm12, %v74_v19  }
  0x94   :  { %v80_v26 = vpop.permute.xlu0 %79  }
  0x95   :  { %82 = vst.msk [vmem:[#allocation0] sm:$0x1] %vm81_vm13, %v80_v26  }
  0x9c   :  { %v85_v27 = vld [vmem:[#allocation0] sm:$0x1] }
  0x9d   :  { %88 = vst [vmem:[%s184_s1] sm:$0x1] %v85_v27 }

// kernel: tile.38
= control target key start
LH: loop header
LB: loop body
LE: loop exit
PB: predicated region body
PF: predicated region fallthrough
CT: control target
= control target key end

     0   :  { %s28_s0 = inlined_call_operand.vmem [shape: f32[4], index: 0, kind: input, shape index: {}]   ;;  %s29_s1 = inlined_call_operand.vmem [shape: f32[16,4], index: 1, kind: output, shape index: {}]  }
   0x1   :  { %v4_v0 = vld [vmem:[%s28_s0] ss:$0 sm:$0xff] }
   0x2   :  { %5 = vst [vmem:[%s29_s1] sm:$0xff] %v4_v0 }
   0x3   :  { %8 = vst [vmem:[%s29_s1 + $0x8] sm:$0xff] %v4_v0 }

// kernel: up_forward.3
= control target key start
LH: loop header
LB: loop body
LE: loop exit
PB: predicated region body
PF: predicated region fallthrough
CT: control target
= control target key end

     0   :  { %s962_s27 = smov 0   ;;  %s1250_s0 = inlined_call_operand.vmem [shape: f32[2,17,64], index: 0, kind: input, shape index: {}]   ;;  %s1251_s1 = inlined_call_operand.vmem [shape: f32[2,20,80], index: 1, kind: input, shape index: {}]   ;;  %s1252_s2 = inlined_call_operand.vmem [shape: f32[2,64,64], index: 2, kind: input, shape index: {}]   ;;  %s1253_s3 = inlined_call_operand.vmem [shape: f32[3,80,56], index: 3, kind: input, shape index: {}]   ;;  %s1254_s4 = inlined_call_operand.vmem [shape: f32[3,64,56], index: 4, kind: input, shape index: {}]   ;;  %s1255_s5 = inlined_call_operand.vmem [shape: f32[1,56], index: 5, kind: input, shape index: {}]   ;;  %s1256_s6 = inlined_call_operand.vmem [shape: f32[2,14,56], index: 6, kind: output, shape index: {0}]   ;;  %s1257_s7 = inlined_call_operand.vmem [shape: f32[2,1,56], index: 7, kind: output, shape index: {1}]   ;;  %s1258_s8 = inlined_call_operand.vmem [shape: f32[2,1,56], index: 8, kind: output, shape index: {2}]  }
   0x1 LB: > { %s827_s28 = sadd.s32 4294967295, %s915_s27   ;;  %p831_p0 = scmp.ge.s32.totalorder %s915_s27, 1  ;;  %s915_s27 = sphi %s962_s27, %s19_s27  }
   0x2   : > { %p277_p1 = scmp.lt.s32.totalorder %s915_s27, 3 }
   0x4   : > { %p278_p2 = pnand %p831_p0, %p277_p1 }
   0x5   : > { %p322_p3 = scmp.lt.s32.totalorder (!%p278_p2), %s827_s28, 1 }
   0x6   : > { %281 = sbr.rel (%p278_p2) target bundleno = 336 (0x150), region = 44 }
   0xb   : > { %v843_v0 = vld [vmem:[%s1252_s2 + $0x78] sm:$0xff]  ;;  %v842_v2 = vld [vmem:[%s1252_s2 + $0x70] sm:$0xff]  ;;  %v841_v4 = vld [vmem:[%s1252_s2 + $0x68] sm:$0xff]  ;;  %s1260_s28 = smov (!%p322_p3, %s827_s28), 1  ;;  %vm394_vm0 = vcmask 1046528   ;;  %vm363_vm1 = vcmask 523264  }
   0xc   : > { %v353_v1 = vld [vmem:[%s1252_s2 + $0x38] sm:$0xff]  ;;  %378 = vmatpush.msra.mxu0 %v843_v0  ;;  %v352_v3 = vld [vmem:[%s1252_s2 + $0x30] sm:$0xff]  ;;  %v351_v5 = vld [vmem:[%s1252_s2 + $0x28] sm:$0xff]  ;;  %s899_s23 = smul.u32 24, %s1260_s28  ;;  %vm476_vm2 = vcmask 654336   ;;  %vm644_vm3 = vcmask 1045504   ;;  %s339_s9 = scalar_lea.vmem %s1257_s7, %s1260_s28 }
   0xd   : > { %412 = vmatpush.msra.mxu1 %v353_v1  ;;  %v840_v6 = vld [vmem:[%s1252_s2 + $0x60] sm:$0xff]  ;;  %v438_v8 = vld [vmem:[%s1253_s3 + $0x48] sm:$0xff]  ;;  %v839_v10 = vld [vmem:[%s1252_s2 + $0x58] sm:$0xff]  ;;  %s898_s20 = sshll.u32 %s1260_s28, 4  ;;  %vm683_vm4 = vcmask 457728   ;;  %vm685_vm5 = vcmask 455680   ;;  %s342_s11 = scalar_lea.vmem %s1258_s8, %s1260_s28 }
   0xe   : > { %379 = vmatpush.msra.mxu0 %v842_v2  ;;  %v350_v7 = vld [vmem:[%s1252_s2 + $0x20] sm:$0xff]  ;;  %v349_v11 = vld [vmem:[%s1252_s2 + $0x18] sm:$0xff]  ;;  %s1014_s14 = scalar_lea.vmem %s1250_s0, %s899_s23  ;;  %489 = vmatpush.msra.mxu3 %v438_v8  ;;  %v838_v16 = vld [vmem:[%s1252_s2 + $0x50] sm:$0xff]  ;;  %s1099_s29 = scalar_lea.vmem %s1251_s1, %s899_s23  ;;  %vm696_vm6 = vcmask 450560  }
   0xf   : > { %413 = vmatpush.msra.mxu1 %v352_v3  ;;  %v437_v9 = vld [vmem:[%s1253_s3 + $0x40] sm:$0xff]  ;;  %v446_v12 = vld [vmem:[%s1254_s4 + $0x38] sm:$0xff]  ;;  %v1021_v14 = vld [vmem:[%s1014_s14 + $0x8] sm:$0xff]  ;;  %s336_s25 = scalar_lea.vmem %s1256_s6, %s898_s20 }
  0x10   : > { %380 = vmatpush.msra.mxu0 %v841_v4  ;;  %v343_v13 = vld [vmem:[%s1014_s14] sm:$0xff]  ;;  %v436_v15 = vld [vmem:[%s1253_s3 + $0x38] sm:$0xff]  ;;  %v348_v17 = vld [vmem:[%s1252_s2 + $0x10] sm:$0xff]  ;;  %490 = vmatpush.msra.mxu3 %v437_v9  ;;  %v396_v20 = vrot.slane %v1021_v14, 1 }
  0x11   : > { %414 = vmatpush.msra.mxu1 %v351_v5  ;;  %461 = vmatpush.msra.mxu2 %v446_v12  ;;  %v445_v18 = vld [vmem:[%s1254_s4 + $0x30] sm:$0xff]  ;;  %v395_v19 = vrot.slane %v343_v13, 1  ;;  %v444_v22 = vld [vmem:[%s1254_s4 + $0x28] sm:$0xff]  ;;  %v443_v26 = vld [vmem:[%s1254_s4 + $0x20] sm:$0xff] }
  0x12   : > { %381 = vmatpush.msra.mxu0 %v840_v6  ;;  %v435_v21 = vld [vmem:[%s1253_s3 + $0x30] sm:$0xff]  ;;  %v837_v23 = vld [vmem:[%s1252_s2 + $0x48] sm:$0xff]  ;;  %491 = vmatpush.msra.mxu3 %v436_v15  ;;  %v836_v27 = vld [vmem:[%s1252_s2 + $0x40] sm:$0xff] }
  0x13   : > { %415 = vmatpush.msra.mxu1 %v350_v7  ;;  %v347_v24 = vld [vmem:[%s1252_s2 + $0x8] sm:$0xff]  ;;  %462 = vmatpush.msra.mxu2 %v445_v18  ;;  %v346_v28 = vld [vmem:[%s1252_s2] sm:$0xff]  ;;  %v345_v29 = vld [vmem:[%s1014_s14 + $0x10] sm:$0x1]  ;;  %v397_v30 = vsel %vm394_vm0, %v395_v19, %v396_v20 }
  0x14   : > { %382 = vmatpush.msra.mxu0 %v839_v10  ;;  %v434_v25 = vld [vmem:[%s1253_s3 + $0x28] sm:$0xff]  ;;  %492 = vmatpush.msra.mxu3 %v435_v21  ;;  %v433_v31 = vld [vmem:[%s1253_s3 + $0x20] sm:$0xff]  ;;  %v861_v32 = vld [vmem:[%s1253_s3 + $0x98] sm:$0xff]  ;;  %v398_v37 = vrot.slane %v345_v29, 1 }
  0x15   : > { %416 = vmatpush.msra.mxu1 %v349_v11  ;;  %463 = vmatpush.msra.mxu2 %v444_v22  ;;  %v442_v33 = vld [vmem:[%s1254_s4 + $0x18] sm:$0xff]  ;;  %v860_v36 = vld [vmem:[%s1253_s3 + $0x90] sm:$0xff]  ;;  %v859_v40 = vld [vmem:[%s1253_s3 + $0x88] sm:$0xff] }
  0x16   : > { %383 = vmatpush.msra.mxu0 %v838_v16  ;;  %493 = vmatpush.msra.mxu3 %v434_v25  ;;  %v871_v34 = vld [vmem:[%s1254_s4 + $0x78] sm:$0xff]  ;;  %v441_v38 = vld [vmem:[%s1254_s4 + $0x10] sm:$0xff]  ;;  %v440_v41 = vld [vmem:[%s1254_s4 + $0x8] sm:$0xff]  ;;  %v399_v44 = vsel %vm394_vm0, %v396_v20, %v398_v37 }
  0x17   : > { %417 = vmatpush.msra.mxu1 %v348_v17  ;;  %464 = vmatpush.msra.mxu2 %v443_v26  ;;  %v432_v35 = vld [vmem:[%s1253_s3 + $0x18] sm:$0xff]  ;;  %v431_v39 = vld [vmem:[%s1253_s3 + $0x10] sm:$0xff]  ;;  %v430_v42 = vld [vmem:[%s1253_s3 + $0x8] sm:$0xff] }
  0x18   : > { %384 = vmatpush.msra.mxu0 %v837_v23  ;;  %494 = vmatpush.msra.mxu3 %v433_v31  ;;  %v858_v43 = vld [vmem:[%s1253_s3 + $0x80] sm:$0xff]  ;;  %v893_v48 = vld [vmem:[%s1254_s4 + $0xb8] sm:$0xff]  ;;  %v883_v50 = vld [vmem:[%s1253_s3 + $0xe8] sm:$0xff] }
  0x19   : > { %418 = vmatpush.msra.mxu1 %v347_v24  ;;  %465 = vmatpush.msra.mxu2 %v442_v33  ;;  %v429_v45 = vld [vmem:[%s1253_s3] sm:$0xff]  ;;  %v857_v49 = vld [vmem:[%s1253_s3 + $0x78] sm:$0xff]  ;;  %v870_v51 = vld [vmem:[%s1254_s4 + $0x70] sm:$0xff] }
  0x1a   : > { %385 = vmatpush.msra.mxu0 %v836_v27  ;;  %495 = vmatpush.msra.mxu3 %v432_v35  ;;  %v439_v46 = vld [vmem:[%s1254_s4] sm:$0xff]  ;;  %v892_v52 = vld [vmem:[%s1254_s4 + $0xb0] sm:$0xff]  ;;  %v869_v55 = vld [vmem:[%s1254_s4 + $0x68] sm:$0xff] }
  0x1b   : > { %419 = vmatpush.msra.mxu1 %v346_v28  ;;  %844 = vmatmul.msk.f32.vlgmr.msra.gmra.mxu0 %vm363_vm1, %v343_v13  ;;  %v427_v47 = vld [vmem:[%s1099_s29 + $0x2] sm:$0xff]  ;;  %v856_v53 = vld [vmem:[%s1253_s3 + $0x70] sm:$0xff]  ;;  %v881_v58 = vld [vmem:[%s1253_s3 + $0xd8] sm:$0xff] }
  0x1c   : > { %846 = vmatmul.msk.f32.vlgmr.msra.gmra.mxu1 %vm363_vm1, %v397_v30  ;;  %531 = vmatpush.msrb.mxu0 %v861_v32  ;;  %v882_v54 = vld [vmem:[%s1253_s3 + $0xe0] sm:$0xff]  ;;  %v891_v56 = vld [vmem:[%s1254_s4 + $0xa8] sm:$0xff]  ;;  %v880_v63 = vld [vmem:[%s1253_s3 + $0xd0] sm:$0xff] }
  0x1d   : > { %574 = vmatpush.msrb.mxu1 %v871_v34  ;;  %466 = vmatpush.msra.mxu2 %v441_v38  ;;  %v855_v57 = vld [vmem:[%s1253_s3 + $0x68] sm:$0xff]  ;;  %v868_v59 = vld [vmem:[%s1254_s4 + $0x60] sm:$0xff]  ;;  %v867_v0 = vld [vmem:[%s1254_s4 + $0x58] sm:$0xff] }
  0x1e   : > { %532 = vmatpush.msrb.mxu0 %v860_v36  ;;  %496 = vmatpush.msra.mxu3 %v431_v39  ;;  %v890_v60 = vld [vmem:[%s1254_s4 + $0xa0] sm:$0xff]  ;;  %v428_v61 = vld [vmem:[%s1099_s29 + $0xa] sm:$0x3f]  ;;  %v889_v1 = vld [vmem:[%s1254_s4 + $0x98] sm:$0xff] }
  0x1f   : > { %467 = vmatpush.msra.mxu2 %v440_v41  ;;  %575 = vmatpush.msrb.mxu1 %v870_v51  ;;  %v854_v62 = vld [vmem:[%s1253_s3 + $0x60] sm:$0xff]  ;;  %v853_v2 = vld [vmem:[%s1253_s3 + $0x58] sm:$0xff]  ;;  %v879_v3 = vld [vmem:[%s1253_s3 + $0xc8] sm:$0xff] }
  0x20   : > { %533 = vmatpush.msrb.mxu0 %v859_v40  ;;  %497 = vmatpush.msra.mxu3 %v430_v42  ;;  %v866_v4 = vld [vmem:[%s1254_s4 + $0x50] sm:$0xff]  ;;  %v878_v7 = vld [vmem:[%s1253_s3 + $0xc0] sm:$0xff]  ;;  %v865_v9 = vld [vmem:[%s1254_s4 + $0x48] sm:$0xff] }
  0x21   : > { %468 = vmatpush.msra.mxu2 %v439_v46  ;;  %576 = vmatpush.msrb.mxu1 %v869_v55  ;;  %v888_v5 = vld [vmem:[%s1254_s4 + $0x90] sm:$0xff]  ;;  %v506_v8 = vld [vmem:[%s1099_s29 + $0x3] sm:$0xff]  ;;  %v877_v11 = vld [vmem:[%s1253_s3 + $0xb8] sm:$0xff] }
  0x22   : > { %534 = vmatpush.msrb.mxu0 %v858_v43  ;;  %498 = vmatpush.msra.mxu3 %v429_v45  ;;  %v852_v6 = vld [vmem:[%s1253_s3 + $0x50] sm:$0xff]  ;;  %v887_v10 = vld [vmem:[%s1254_s4 + $0x88] sm:$0xff]  ;;  %v864_v12 = vld [vmem:[%s1254_s4 + $0x40] sm:$0xff] }
  0x23   : > { %845 = vmatmul.msk.f32.gmra.mxu0 %vm363_vm1, %v1021_v14  ;;  %850 = vmatmul.msk.f32.vlgmr.msra.gmra.mxu3 %vm476_vm2, %v427_v47  ;;  %v886_v13 = vld [vmem:[%s1254_s4 + $0x80] sm:$0xff]  ;;  %v876_v14 = vld [vmem:[%s1253_s3 + $0xb0] sm:$0xff]  ;;  %v875_v15 = vld [vmem:[%s1253_s3 + $0xa8] sm:$0xff] }
  0x24   : > { %847 = vmatmul.msk.f32.gmra.mxu1 %vm363_vm1, %v399_v44  ;;  %660 = vmatpush.msrb.mxu3 %v893_v48  ;;  %v874_v16 = vld [vmem:[%s1253_s3 + $0xa0] sm:$0xff]  ;;  %v507_v17 = vld [vmem:[%s1099_s29 + $0xb] sm:$0x3f] }
  0x25   : > { %535 = vmatpush.msrb.mxu0 %v857_v49  ;;  %616 = vmatpush.msrb.mxu2 %v883_v50  ;;  %v591_v30 = vld [vmem:[%s1099_s29 + $0x4] sm:$0xff]  ;;  %v592_v31 = vld [vmem:[%s1099_s29 + $0xc] sm:$0x3f]  ;;  %v908_v46 = vld [vmem:[%s1255_s5] ss:$0 sm:$0xff] }
  0x26   : > { %661 = vmatpush.msrb.mxu3 %v892_v52  ;;  %577 = vmatpush.msrb.mxu1 %v868_v59 }
  0x27   : > { %536 = vmatpush.msrb.mxu0 %v856_v53  ;;  %617 = vmatpush.msrb.mxu2 %v882_v54 }
  0x28   : > { %662 = vmatpush.msrb.mxu3 %v891_v56  ;;  %578 = vmatpush.msrb.mxu1 %v867_v0 }
  0x29   : > { %537 = vmatpush.msrb.mxu0 %v855_v57  ;;  %618 = vmatpush.msrb.mxu2 %v881_v58 }
  0x2a   : > { %663 = vmatpush.msrb.mxu3 %v890_v60  ;;  %579 = vmatpush.msrb.mxu1 %v866_v4 }
  0x2b   : > { %851 = vmatmul.msk.f32.gmra.mxu3 %vm476_vm2, %v428_v61  ;;  %538 = vmatpush.msrb.mxu0 %v854_v62 }
  0x2c   : > { %619 = vmatpush.msrb.mxu2 %v880_v63  ;;  %664 = vmatpush.msrb.mxu3 %v889_v1 }
  0x2d   : > { %539 = vmatpush.msrb.mxu0 %v853_v2  ;;  %580 = vmatpush.msrb.mxu1 %v865_v9 }
  0x2e   : > { %620 = vmatpush.msrb.mxu2 %v879_v3  ;;  %665 = vmatpush.msrb.mxu3 %v888_v5 }
  0x2f   : > { %540 = vmatpush.msrb.mxu0 %v852_v6  ;;  %581 = vmatpush.msrb.mxu1 %v864_v12 }
  0x30   : > { %621 = vmatpush.msrb.mxu2 %v878_v7  ;;  %862 = vmatmul.msk.f32.vlgmr.msrb.gmra.mxu0 %vm476_vm2, %v506_v8 }
  0x31   : > { %666 = vmatpush.msrb.mxu3 %v887_v10 }
  0x32   : > { %622 = vmatpush.msrb.mxu2 %v877_v11 }
  0x33   : > { %667 = vmatpush.msrb.mxu3 %v886_v13 }
  0x34   : > { %623 = vmatpush.msrb.mxu2 %v876_v14 }
  0x36   : > { %624 = vmatpush.msrb.mxu2 %v875_v15 }
  0x38   : > { %625 = vmatpush.msrb.mxu2 %v874_v16  ;;  %863 = vmatmul.msk.f32.gmra.mxu0 %vm476_vm2, %v507_v17 }
  0x98   : > { %v387_v18 = vpop.f32.mrf.mxu0 }
  0x99   : > { %v421_v19 = vpop.f32.mrf.mxu1 }
  0x9a   : > { %v422_v20 = vadd.f32 %v421_v19, %v387_v18 }
  0x9c   : > { %848 = vmatmul.msk.f32.vlgmr.msra.gmra.mxu2 %vm363_vm1, %v422_v20  ;;  %v559_v24 = vrot.slane %v422_v20, 1  ;;  %v645_v25 = vrot.slane %v422_v20, 2 }
  0xa0   : > { %v390_v21 = vpop.f32.mrf.mxu0 }
  0xa1   : > { %v424_v22 = vpop.f32.mrf.mxu1 }
  0xa2   : > { %v425_v23 = vadd.f32 %v424_v22, %v390_v21 }
  0xa4   : > { %v560_v26 = vrot.slane %v425_v23, 1  ;;  %v646_v27 = vrot.slane %v425_v23, 2  ;;  %849 = vmatmul.msk.f32.gmra.mxu2 %vm363_vm1, %v425_v23 }
  0xa6   : > { %v561_v28 = vsel %vm394_vm0, %v559_v24, %v560_v26  ;;  %v647_v29 = vsel %vm644_vm3, %v645_v25, %v646_v27  ;;  %v500_v32 = vpop.f32.mrf.mxu3 }
  0xa7   : > { %872 = vmatmul.msk.f32.vlgmr.msrb.gmra.mxu1 %vm363_vm1, %v561_v28  ;;  %894 = vmatmul.msk.f32.vlgmr.msrb.gmra.mxu3 %vm363_vm1, %v647_v29 }
  0xac   : > { %884 = vmatmul.msk.f32.vlgmr.msrb.gmra.mxu2 %vm476_vm2, %v591_v30 }
  0xad   : > { %v542_v34 = vpop.f32.mrf.mxu0 }
  0xae   : > { %v503_v35 = vpop.f32.mrf.mxu3 }
  0xaf   : > { %873 = vmatmul.msk.f32.gmra.mxu1 %vm363_vm1, %v560_v26  ;;  %895 = vmatmul.msk.f32.gmra.mxu3 %vm363_vm1, %v646_v27 }
  0xb4   : > { %885 = vmatmul.msk.f32.gmra.mxu2 %vm476_vm2, %v592_v31 }
  0xb5   : > { %v545_v42 = vpop.f32.mrf.mxu0 }
 0x11f   : > { %v470_v33 = vpop.f32.mrf.mxu2 }
 0x120   : > { %v501_v36 = vadd.f32 %v500_v32, %v470_v33 }
 0x122   : > { %v548_v39 = vadd.f32 %v542_v34, %v501_v36 }
 0x124   : > { %v583_v38 = vpop.f32.mrf.mxu1 }
 0x125   : > { %v589_v40 = vadd.f32 %v583_v38, %v548_v39 }
 0x127   : > { %v473_v37 = vpop.f32.mrf.mxu2 }
 0x128   : > { %v504_v41 = vadd.f32 %v503_v35, %v473_v37 }
 0x12a   : > { %v669_v43 = vpop.f32.mrf.mxu3  ;;  %v549_v47 = vadd.f32 %v545_v42, %v504_v41 }
 0x12c   : > { %v586_v49 = vpop.f32.mrf.mxu1 }
 0x12d   : > { %v590_v51 = vadd.f32 %v586_v49, %v549_v47 }
 0x12f   : > { %v627_v44 = vpop.f32.mrf.mxu2 }
 0x130   : > { %v633_v45 = vadd.f32 %v627_v44, %v589_v40 }
 0x132   : > { %v675_v48 = vadd.f32 %v669_v43, %v633_v45  ;;  %v672_v54 = vpop.f32.mrf.mxu3 }
 0x134   : > { %v681_v50 = vadd.f32 %v908_v46, %v675_v48 }
 0x136   : > { %684 = vst.msk [vmem:[%s336_s25] sm:$0xff] %vm683_vm4, %v681_v50  ;;  %v698_v56 = vmul.f32 %v681_v50, %v681_v50  ;;  %v687_v58 = vsel %vm683_vm4, %v681_v50, 0.0 }
 0x137   : > { %v630_v52 = vpop.f32.mrf.mxu2 }
 0x138   : > { %v634_v53 = vadd.f32 %v630_v52, %v590_v51  ;;  %v700_v62 = vsel %vm683_vm4, %v698_v56, 0.0 }
 0x13a   : > { %v676_v55 = vadd.f32 %v672_v54, %v634_v53 }
 0x13c   : > { %v682_v57 = vadd.f32 %v908_v46, %v676_v55 }
 0x13e   : > { %686 = vst.msk [vmem:[%s336_s25 + $0x8] sm:$0x3f] %vm685_vm5, %v682_v57  ;;  %v688_v59 = vsel %vm685_vm5, %v682_v57, 0.0  ;;  %v699_v60 = vmul.f32 %v682_v57, %v682_v57 }
 0x13f   : > { %v689_v61 = vadd.f32 %v688_v59, %v687_v58 }
 0x140   : > { %v701_v63 = vsel %vm685_vm5, %v699_v60, 0.0 }
 0x141   : > { %v690_v0 = vrot.slane %v689_v61, 4  ;;  %v702_v1 = vadd.f32 %v701_v63, %v700_v62 }
 0x143   : > { %v691_v2 = vadd.f32 %v690_v0, %v689_v61  ;;  %v703_v3 = vrot.slane %v702_v1, 4 }
 0x145   : > { %v692_v4 = vrot.slane %v691_v2, 2  ;;  %v704_v5 = vadd.f32 %v703_v3, %v702_v1 }
 0x147   : > { %v693_v6 = vadd.f32 %v692_v4, %v691_v2  ;;  %v705_v7 = vrot.slane %v704_v5, 2 }
 0x149   : > { %v694_v8 = vrot.slane %v693_v6, 1  ;;  %v706_v9 = vadd.f32 %v705_v7, %v704_v5 }
 0x14b   : > { %v695_v10 = vadd.f32 %v694_v8, %v693_v6  ;;  %v707_v11 = vrot.slane %v706_v9, 1 }
 0x14d   : > { %697 = vst.msk [vmem:[%s339_s9] sm:$0x1] %vm696_vm6, %v695_v10  ;;  %v708_v12 = vadd.f32 %v707_v11, %v706_v9 }
 0x14f   : > { %709 = vst.msk [vmem:[%s342_s11] sm:$0x1] %vm696_vm6, %v708_v12 }
 0x150 PF: > { %s19_s27 = sadd.s32 1, %s915_s27  }
 0x151   : > { %p16_p4 = scmp.ge.s32.totalorder %s19_s27, 4  }
 0x153   :  { %18 = sbr.rel (!%p16_p4) target bundleno = 1 (0x1), region = 106 }

// kernel: tile.48
= control target key start
LH: loop header
LB: loop body
LE: loop exit
PB: predicated region body
PF: predicated region fallthrough
CT: control target
= control target key end

     0   :  { %s28_s0 = inlined_call_operand.vmem [shape: f32[4], index: 0, kind: input, shape index: {}]   ;;  %s29_s1 = inlined_call_operand.vmem [shape: f32[12,4], index: 1, kind: output, shape index: {}]  }
   0x1   :  { %v4_v0 = vld [vmem:[%s28_s0] ss:$0 sm:$0xff] }
   0x2   :  { %5 = vst [vmem:[%s29_s1] sm:$0xff] %v4_v0 }
   0x3   :  { %8 = vst [vmem:[%s29_s1 + $0x8] sm:$0xff] %v4_v0 }

// kernel: tile.49
= control target key start
LH: loop header
LB: loop body
LE: loop exit
PB: predicated region body
PF: predicated region fallthrough
CT: control target
= control target key end

     0   :  { %s99_s10 = smov 44   ;;  %s100_s11 = smov 36   ;;  %vm3_vm0 = vcmask 31744   ;;  %vm9_vm1 = vcmask 392544   ;;  %vm15_vm2 = vcmask 359744   ;;  %vm21_vm3 = vcmask 326944   ;;  %s159_s0 = inlined_call_operand.vmem [shape: f32[12,4], index: 0, kind: input, shape index: {}]   ;;  %s160_s1 = inlined_call_operand.vmem [shape: f32[1,48], index: 1, kind: output, shape index: {}]  }
   0x1   :  { %v77_v0 = vld [vmem:[%s159_s0 + $0xb] sm:$0x1]   ;;  %v79_v1 = vld [vmem:[%s159_s0 + $0x9] sm:$0x1]   ;;  %v81_v2 = vld [vmem:[%s159_s0 + $0x7] sm:$0x1]  }
   0x2   :  { %7 = vrot.lane.b32.xlu0 %v77_v0, %s99_s10  ;;  %19 = vrot.lane.b32.xlu1 %v79_v1, %s100_s11  ;;  %s101_s14 = smov 28   ;;  %v78_v3 = vld [vmem:[%s159_s0 + $0xa] sm:$0x1]   ;;  %v80_v4 = vld [vmem:[%s159_s0 + $0x8] sm:$0x1]   ;;  %s102_s19 = smov 40  }
   0x3   :  { %31 = vrot.lane.b32.xlu2 %v81_v2, %s101_s14  ;;  %s103_s20 = smov 32   ;;  %v82_v5 = vld [vmem:[%s159_s0 + $0x6] sm:$0x1]   ;;  %s104_s23 = smov 24   ;;  %v83_v6 = vld [vmem:[%s159_s0 + $0x5] sm:$0x1]  }
   0x4   :  { %v84_v7 = vld [vmem:[%s159_s0 + $0x4] sm:$0x1]   ;;  %s105_s28 = smov 20   ;;  %s106_s29 = smov 16   ;;  %v85_v8 = vld [vmem:[%s159_s0 + $0x3] sm:$0x1]  }
   0x5   :  { %s107_s3 = smov 12   ;;  %v86_v9 = vld [vmem:[%s159_s0 + $0x2] sm:$0x1]   ;;  %v87_v10 = vld [vmem:[%s159_s0 + $0x1] sm:$0x1]   ;;  %s108_s8 = smov 8  }
   0x6   :  { %s109_s9 = smov 4   ;;  %v2_v11 = vld [vmem:[%s159_s0] sm:$0x1]   ;;  %vm27_vm4 = vcmask 294144   ;;  %vm33_vm5 = vcmask 261344   ;;  %vm39_vm6 = vcmask 228544  }
   0x7   :  { %4 = vst.msk [vmem:[#allocation0] sm:$0x1] %vm3_vm0, %v2_v11   ;;  %vm45_vm7 = vcmask 195744   ;;  %vm51_vm8 = vcmask 162944   ;;  %vm57_vm9 = vcmask 130144   ;;  %vm63_vm10 = vcmask 97344  }
   0x8   :  { %vm69_vm11 = vcmask 64544  }
   0xa   :  { %13 = vrot.lane.b32.xlu0 %v78_v3, %s102_s19  ;;  %25 = vrot.lane.b32.xlu1 %v80_v4, %s103_s20 }
   0xb   :  { %37 = vrot.lane.b32.xlu2 %v82_v5, %s104_s23 }
  0x12   :  { %43 = vrot.lane.b32.xlu0 %v83_v6, %s105_s28  ;;  %49 = vrot.lane.b32.xlu1 %v84_v7, %s106_s29 }
  0x13   :  { %55 = vrot.lane.b32.xlu2 %v85_v8, %s107_s3 }
  0x1a   :  { %61 = vrot.lane.b32.xlu0 %v86_v9, %s108_s8  ;;  %67 = vrot.lane.b32.xlu1 %v87_v10, %s109_s9 }
  0x5d   :  { %v32_v12 = vpop.permute.xlu2 %31  }
  0x65   :  { %v38_v13 = vpop.permute.xlu2 %37  }
  0x6d   :  { %v56_v14 = vpop.permute.xlu2 %55  }
  0x74   :  { %v8_v15 = vpop.permute.xlu0 %7   ;;  %v20_v16 = vpop.permute.xlu1 %19  }
  0x75   :  { %10 = vst.msk [vmem:[#allocation0] sm:$0x1] %vm9_vm1, %v8_v15  }
  0x7c   :  { %v14_v17 = vpop.permute.xlu0 %13   ;;  %v26_v18 = vpop.permute.xlu1 %25  }
  0x7d   :  { %16 = vst.msk [vmem:[#allocation0] sm:$0x1] %vm15_vm2, %v14_v17  }
  0x7e   :  { %22 = vst.msk [vmem:[#allocation0] sm:$0x1] %vm21_vm3, %v20_v16  }
  0x7f   :  { %28 = vst.msk [vmem:[#allocation0] sm:$0x1] %vm27_vm4, %v26_v18  }
  0x80   :  { %34 = vst.msk [vmem:[#allocation0] sm:$0x1] %vm33_vm5, %v32_v12  }
  0x81   :  { %40 = vst.msk [vmem:[#allocation0] sm:$0x1] %vm39_vm6, %v38_v13  }
  0x84   :  { %v44_v19 = vpop.permute.xlu0 %43   ;;  %v50_v20 = vpop.permute.xlu1 %49  }
  0x85   :  { %46 = vst.msk [vmem:[#allocation0] sm:$0x1] %vm45_vm7, %v44_v19  }
  0x86   :  { %52 = vst.msk [vmem:[#allocation0] sm:$0x1] %vm51_vm8, %v50_v20  }
  0x87   :  { %58 = vst.msk [vmem:[#allocation0] sm:$0x1] %vm57_vm9, %v56_v14  }
  0x8c   :  { %v62_v21 = vpop.permute.xlu0 %61   ;;  %v68_v22 = vpop.permute.xlu1 %67  }
  0x8d   :  { %64 = vst.msk [vmem:[#allocation0] sm:$0x1] %vm63_vm10, %v62_v21  }
  0x8e   :  { %70 = vst.msk [vmem:[#allocation0] sm:$0x1] %vm69_vm11, %v68_v22  }
  0x95   :  { %v73_v23 = vld [vmem:[#allocation0] sm:$0x1] }
  0x96   :  { %76 = vst [vmem:[%s160_s1] sm:$0x1] %v73_v23 }

// kernel: up_forward.4
= control target key start
LH: loop header
LB: loop body
LE: loop exit
PB: predicated region body
PF: predicated region fallthrough
CT: control target
= control target key end

     0   :  { %s666_s24 = smov 0   ;;  %s779_s0 = inlined_call_operand.vmem [shape: f32[2,14,56], index: 0, kind: input, shape index: {}]   ;;  %s780_s1 = inlined_call_operand.vmem [shape: f32[1,56], index: 1, kind: input, shape index: {}]   ;;  %s781_s2 = inlined_call_operand.vmem [shape: f32[1,56], index: 2, kind: input, shape index: {}]   ;;  %s782_s3 = inlined_call_operand.vmem [shape: f32[3,56,48], index: 3, kind: input, shape index: {}]   ;;  %s783_s4 = inlined_call_operand.vmem [shape: f32[1,48], index: 4, kind: input, shape index: {}]   ;;  %s784_s5 = inlined_call_operand.vmem [shape: f32[2,12,48], index: 5, kind: output, shape index: {0}]   ;;  %s785_s6 = inlined_call_operand.vmem [shape: f32[2,1,48], index: 6, kind: output, shape index: {1}]   ;;  %s786_s7 = inlined_call_operand.vmem [shape: f32[2,1,48], index: 7, kind: output, shape index: {2}]  }
   0x1 LB: > { %s567_s25 = sadd.s32 4294967295, %s624_s24   ;;  %p571_p0 = scmp.ge.s32.totalorder %s624_s24, 1  ;;  %s624_s24 = sphi %s666_s24, %s18_s24  }
   0x2   : > { %p242_p1 = scmp.lt.s32.totalorder %s624_s24, 3 }
   0x4   : > { %p243_p2 = pnand %p571_p0, %p242_p1 }
   0x5   : > { %p280_p3 = scmp.lt.s32.totalorder (!%p243_p2), %s567_s25, 1 }
   0x6   : > { %246 = sbr.rel (%p243_p2) target bundleno = 189 (0xbd), region = 40 }
   0xb   : > { %v593_v0 = vld [vmem:[%s782_s3 + $0xa0] sm:$0xff]  ;;  %v592_v1 = vld [vmem:[%s782_s3 + $0x98] sm:$0xff]  ;;  %v582_v2 = vld [vmem:[%s782_s3 + $0x68] sm:$0xff]  ;;  %s788_s25 = smov (!%p280_p3, %s567_s25), 1  ;;  %vm333_vm0 = vcmask 457728   ;;  %vm396_vm1 = vcmask 1045504  }
   0xc   : > { %413 = vmatpush.msra.mxu2 %v593_v0  ;;  %347 = vmatpush.msra.mxu0 %v582_v2  ;;  %v318_v3 = vld [vmem:[%s782_s3 + $0x30] sm:$0xff]  ;;  %v581_v4 = vld [vmem:[%s782_s3 + $0x60] sm:$0xff]  ;;  %v317_v6 = vld [vmem:[%s782_s3 + $0x28] sm:$0xff]  ;;  %s598_s29 = sshll.u32 %s788_s25, 4  ;;  %vm329_vm2 = vcmask 1046528   ;;  %vm435_vm3 = vcmask 392192   ;;  %s292_s18 = scalar_lea.vmem %s785_s6, %s788_s25 }
   0xd   : > { %374 = vmatpush.msra.mxu1 %v318_v3  ;;  %v591_v5 = vld [vmem:[%s782_s3 + $0x90] sm:$0xff]  ;;  %600 = vmatpush.msra.mxu3 %v582_v2  ;;  %v580_v7 = vld [vmem:[%s782_s3 + $0x58] sm:$0xff]  ;;  %v316_v8 = vld [vmem:[%s782_s3 + $0x20] sm:$0xff]  ;;  %s284_s13 = scalar_lea.vmem %s779_s0, %s598_s29  ;;  %s289_s16 = scalar_lea.vmem %s784_s5, %s598_s29  ;;  %vm437_vm4 = vcmask 388096   ;;  %vm448_vm5 = vcmask 385024  }
   0xe   : > { %414 = vmatpush.msra.mxu2 %v592_v1  ;;  %348 = vmatpush.msra.mxu0 %v581_v4  ;;  %v590_v9 = vld [vmem:[%s782_s3 + $0x88] sm:$0xff]  ;;  %v589_v10 = vld [vmem:[%s782_s3 + $0x80] sm:$0xff]  ;;  %v579_v11 = vld [vmem:[%s782_s3 + $0x50] sm:$0xff]  ;;  %s295_s21 = scalar_lea.vmem %s786_s7, %s788_s25 }
   0xf   : > { %375 = vmatpush.msra.mxu1 %v317_v6  ;;  %601 = vmatpush.msra.mxu3 %v581_v4  ;;  %v315_v12 = vld [vmem:[%s782_s3 + $0x18] sm:$0xff]  ;;  %v578_v13 = vld [vmem:[%s782_s3 + $0x48] sm:$0xff]  ;;  %v296_v14 = vld [vmem:[%s284_s13] sm:$0xff] }
  0x10   : > { %415 = vmatpush.msra.mxu2 %v591_v5  ;;  %349 = vmatpush.msra.mxu0 %v580_v7  ;;  %v297_v15 = vld [vmem:[%s284_s13 + $0x8] sm:$0x3f]  ;;  %v615_v16 = vld [vmem:[%s780_s1] ss:$0 sm:$0xff]  ;;  %v314_v17 = vld [vmem:[%s782_s3 + $0x10] sm:$0xff] }
  0x11   : > { %376 = vmatpush.msra.mxu1 %v316_v8  ;;  %602 = vmatpush.msra.mxu3 %v580_v7  ;;  %v616_v18 = vld [vmem:[%s781_s2] ss:$0 sm:$0xff]  ;;  %v588_v19 = vld [vmem:[%s782_s3 + $0x78] sm:$0xff]  ;;  %v302_v20 = vmul.f32 %v615_v16, %v296_v14  ;;  %v303_v21 = vmul.f32 %v615_v16, %v297_v15  ;;  %v313_v23 = vld [vmem:[%s782_s3 + $0x8] sm:$0xff] }
  0x12   : > { %416 = vmatpush.msra.mxu2 %v590_v9  ;;  %350 = vmatpush.msra.mxu0 %v579_v11  ;;  %v577_v22 = vld [vmem:[%s782_s3 + $0x40] sm:$0xff]  ;;  %v587_v24 = vld [vmem:[%s782_s3 + $0x70] sm:$0xff]  ;;  %v576_v27 = vld [vmem:[%s782_s3 + $0x38] sm:$0xff] }
  0x13   : > { %377 = vmatpush.msra.mxu1 %v315_v12  ;;  %603 = vmatpush.msra.mxu3 %v579_v11  ;;  %v308_v25 = vadd.f32 %v616_v18, %v302_v20  ;;  %v309_v26 = vadd.f32 %v616_v18, %v303_v21  ;;  %v312_v28 = vld [vmem:[%s782_s3] sm:$0xff] }
  0x14   : > { %417 = vmatpush.msra.mxu2 %v589_v10  ;;  %351 = vmatpush.msra.mxu0 %v578_v13  ;;  %v617_v40 = vld [vmem:[%s783_s4] ss:$0 sm:$0xff] }
  0x15   : > { %378 = vmatpush.msra.mxu1 %v314_v17  ;;  %604 = vmatpush.msra.mxu3 %v578_v13  ;;  %v310_v29 = vmax.f32 %v308_v25, 0.0  ;;  %v311_v30 = vmax.f32 %v309_v26, 0.0 }
  0x16   : > { %418 = vmatpush.msra.mxu2 %v588_v19  ;;  %352 = vmatpush.msra.mxu0 %v577_v22 }
  0x17   : > { %379 = vmatpush.msra.mxu1 %v313_v23  ;;  %605 = vmatpush.msra.mxu3 %v577_v22  ;;  %v397_v31 = vrot.slane %v310_v29, 2  ;;  %v398_v32 = vrot.slane %v311_v30, 2  ;;  %v330_v33 = vrot.slane %v310_v29, 1  ;;  %v331_v34 = vrot.slane %v311_v30, 1 }
  0x18   : > { %419 = vmatpush.msra.mxu2 %v587_v24  ;;  %353 = vmatpush.msra.mxu0 %v576_v27 }
  0x19   : > { %380 = vmatpush.msra.mxu1 %v312_v28  ;;  %606 = vmatpush.msra.mxu3 %v576_v27  ;;  %v399_v35 = vsel %vm396_vm1, %v397_v31, %v398_v32  ;;  %v332_v36 = vsel %vm329_vm2, %v330_v33, %v331_v34 }
  0x1a   : > { %585 = vmatmul.msk.f32.vlgmr.msra.gmra.mxu1 %vm333_vm0, %v310_v29  ;;  %584 = vmatmul.msk.f32.vlgmr.msra.gmra.mxu3 %vm333_vm0, %v331_v34 }
  0x1b   : > { %594 = vmatmul.msk.f32.vlgmr.msra.gmra.mxu2 %vm333_vm0, %v399_v35  ;;  %583 = vmatmul.msk.f32.vlgmr.msra.gmra.mxu0 %vm333_vm0, %v332_v36 }
  0x22   : > { %586 = vmatmul.msk.f32.gmra.mxu1 %vm333_vm0, %v311_v30 }
  0x23   : > { %595 = vmatmul.msk.f32.gmra.mxu2 %vm333_vm0, %v398_v32 }
  0x97   : > { %v382_v37 = vpop.f32.mrf.mxu1 }
  0x98   : > { %v355_v38 = vpop.f32.mrf.mxu0 }
  0x99   : > { %v383_v39 = vadd.f32 %v382_v37, %v355_v38 }
  0x9d   : > { %v358_v43 = vpop.f32.mrf.mxu3 }
  0x9e   : > { %v421_v41 = vpop.f32.mrf.mxu2 }
  0x9f   : > { %v427_v42 = vadd.f32 %v421_v41, %v383_v39  ;;  %v385_v44 = vpop.f32.mrf.mxu1 }
  0xa0   : > { %v386_v46 = vadd.f32 %v385_v44, %v358_v43 }
  0xa1   : > { %v433_v45 = vadd.f32 %v617_v40, %v427_v42 }
  0xa3   : > { %436 = vst.msk [vmem:[%s289_s16] sm:$0xff] %vm435_vm3, %v433_v45  ;;  %v450_v49 = vmul.f32 %v433_v45, %v433_v45  ;;  %v439_v51 = vsel %vm435_vm3, %v433_v45, 0.0 }
  0xa5   : > { %v452_v55 = vsel %vm435_vm3, %v450_v49, 0.0 }
  0xa6   : > { %v424_v47 = vpop.f32.mrf.mxu2 }
  0xa7   : > { %v428_v48 = vadd.f32 %v424_v47, %v386_v46 }
  0xa9   : > { %v434_v50 = vadd.f32 %v617_v40, %v428_v48 }
  0xab   : > { %438 = vst.msk [vmem:[%s289_s16 + $0x8] sm:$0xf] %vm437_vm4, %v434_v50  ;;  %v440_v52 = vsel %vm437_vm4, %v434_v50, 0.0  ;;  %v451_v53 = vmul.f32 %v434_v50, %v434_v50 }
  0xac   : > { %v441_v54 = vadd.f32 %v440_v52, %v439_v51 }
  0xad   : > { %v453_v56 = vsel %vm437_vm4, %v451_v53, 0.0 }
  0xae   : > { %v442_v57 = vrot.slane %v441_v54, 4  ;;  %v454_v58 = vadd.f32 %v453_v56, %v452_v55 }
  0xb0   : > { %v443_v59 = vadd.f32 %v442_v57, %v441_v54  ;;  %v455_v60 = vrot.slane %v454_v58, 4 }
  0xb2   : > { %v444_v61 = vrot.slane %v443_v59, 2  ;;  %v456_v62 = vadd.f32 %v455_v60, %v454_v58 }
  0xb4   : > { %v445_v63 = vadd.f32 %v444_v61, %v443_v59  ;;  %v457_v0 = vrot.slane %v456_v62, 2 }
  0xb6   : > { %v446_v1 = vrot.slane %v445_v63, 1  ;;  %v458_v2 = vadd.f32 %v457_v0, %v456_v62 }
  0xb8   : > { %v447_v3 = vadd.f32 %v446_v1, %v445_v63  ;;  %v459_v4 = vrot.slane %v458_v2, 1 }
  0xba   : > { %449 = vst.msk [vmem:[%s292_s18] sm:$0x1] %vm448_vm5, %v447_v3  ;;  %v460_v5 = vadd.f32 %v459_v4, %v458_v2 }
  0xbc   : > { %461 = vst.msk [vmem:[%s295_s21] sm:$0x1] %vm448_vm5, %v460_v5 }
  0xbd PF: > { %s18_s24 = sadd.s32 1, %s624_s24  }
  0xbe   : > { %p15_p4 = scmp.ge.s32.totalorder %s18_s24, 4  }
  0xc0   :  { %17 = sbr.rel (!%p15_p4) target bundleno = 1 (0x1), region = 96 }

// kernel: up_forward.5
= control target key start
LH: loop header
LB: loop body
LE: loop exit
PB: predicated region body
PF: predicated region fallthrough
CT: control target
= control target key end

     0   :  { %s297_s12 = smov 0   ;;  %s314_s0 = inlined_call_operand.vmem [shape: f32[2,12,48], index: 0, kind: input, shape index: {}, may-alias: {0,3}]   ;;  %s315_s1 = inlined_call_operand.vmem [shape: f32[1,48], index: 1, kind: input, shape index: {}]   ;;  %s316_s2 = inlined_call_operand.vmem [shape: f32[1,48], index: 2, kind: input, shape index: {}]   ;;  %s317_s3 = inlined_call_operand.vmem [shape: f32[2,12,48], index: 3, kind: output, shape index: {}, may-alias: {0,3}]  }
   0x1 LB: > { %s246_s13 = sadd.s32 4294967295, %s275_s12   ;;  %p250_p0 = scmp.ge.s32.totalorder %s275_s12, 1  ;;  %s275_s12 = sphi %s297_s12, %s13_s12  }
   0x2   : > { %p137_p1 = scmp.lt.s32.totalorder %s275_s12, 3 }
   0x4   : > { %p138_p2 = pnand %p250_p0, %p137_p1 }
   0x5   : > { %p161_p3 = scmp.lt.s32.totalorder (!%p138_p2), %s246_s13, 1 }
   0x6   : > { %141 = sbr.rel (%p138_p2) target bundleno = 23 (0x17), region = 32 }
   0xb   : > { %s319_s13 = smov (!%p161_p3, %s246_s13), 1  ;;  %v267_v0 = vld [vmem:[%s315_s1] ss:$0 sm:$0xff]  ;;  %vm187_vm0 = vcmask 392192   ;;  %vm189_vm1 = vcmask 388096  }
   0xc   : > { %s257_s16 = sshll.u32 %s319_s13, 4  ;;  %v268_v1 = vld [vmem:[%s316_s2] ss:$0 sm:$0xff] }
   0xd   : > { %s165_s19 = scalar_lea.vmem %s314_s0, %s257_s16  ;;  %s170_s24 = scalar_lea.vmem %s317_s3, %s257_s16 }
   0xe   : > { %v171_v2 = vld [vmem:[%s165_s19] sm:$0xff]  ;;  %v172_v3 = vld [vmem:[%s165_s19 + $0x8] sm:$0xf] }
   0xf   : > { %v177_v4 = vmul.f32 %v267_v0, %v171_v2  ;;  %v178_v5 = vmul.f32 %v267_v0, %v172_v3 }
  0x11   : > { %v183_v6 = vadd.f32 %v268_v1, %v177_v4  ;;  %v184_v7 = vadd.f32 %v268_v1, %v178_v5 }
  0x13   : > { %v185_v8 = vmax.f32 %v183_v6, 0.0  ;;  %v186_v9 = vmax.f32 %v184_v7, 0.0 }
  0x15   : > { %188 = vst.msk [vmem:[%s170_s24] sm:$0xff] %vm187_vm0, %v185_v8 }
  0x16   : > { %190 = vst.msk [vmem:[%s170_s24 + $0x8] sm:$0xf] %vm189_vm1, %v186_v9 }
  0x17 PF: > { %s13_s12 = sadd.s32 1, %s275_s12  }
  0x18   : > { %p10_p4 = scmp.ge.s32.totalorder %s13_s12, 4  }
  0x1a   :  { %12 = sbr.rel (!%p10_p4) target bundleno = 1 (0x1), region = 62 }

</bundles_post_ra>
